<compile_context>
chip_gen: v7x
topology: tpu7x:2x2x1
jax: 0.10.0
libtpu: 0.0.40
codegen_flags: <defaults>
</compile_context>

<pallas_src>
import jax
import jax.numpy as jnp
from jax.experimental import pallas as pl
from jax.experimental.pallas import tpu as pltpu

HIDDEN = 768
EPS = 1e-12


def _round_up(n, m):
    return ((n + m - 1) // m) * m


def bert_self_output_kernel(x_ref, w_ref, b_ref, g_ref, beta_ref, o_ref):
    # x_ref:    (TM, H) activations in their HBM dtype (f32 or bf16)
    # w_ref:    (H, H) bf16 weight, resident across the grid (constant index_map)
    # b_ref, g_ref, beta_ref: (1, H) f32
    # o_ref:    (TM, H) output dtype (bf16 by default)

    # Cast to the matmul dtype HERE (in VMEM), not as a separate XLA HBM pass.
    x = x_ref[...].astype(w_ref.dtype)

    # Dense: MXU matmul (bf16 operands) with f32 accumulation; bias add in f32.
    y = jnp.dot(x, w_ref[...], preferred_element_type=jnp.float32)
    y = y + b_ref[...]

    # Dropout(p=0.1): identity in eval/inference mode.

    # LayerNorm over the hidden axis in f32 (biased variance, eps=1e-12,
    # matching torch.nn.LayerNorm).  One-pass variance keeps the two row
    # reductions independent; clamp guards against tiny negative cancellation.
    mean = jnp.mean(y, axis=-1, keepdims=True)
    mean_sq = jnp.mean(y * y, axis=-1, keepdims=True)
    var = jnp.maximum(mean_sq - mean * mean, 0.0)
    inv = jax.lax.rsqrt(var + EPS)
    o_ref[...] = ((y - mean) * (inv * g_ref[...]) + beta_ref[...]).astype(o_ref.dtype)


def prepare_params(weight, bias, gamma, beta, *, matmul_dtype=jnp.bfloat16):
    """One-time parameter prep: transpose (out,in)->(in,out) and cast for the MXU.

    Call this at weight-load time, NOT per forward call.
    """
    w_t = jnp.asarray(weight).T.astype(matmul_dtype)          # (in, out)
    b2d = jnp.asarray(bias, jnp.float32).reshape(1, HIDDEN)
    g2d = jnp.asarray(gamma, jnp.float32).reshape(1, HIDDEN)
    beta2d = jnp.asarray(beta, jnp.float32).reshape(1, HIDDEN)
    return w_t, b2d, g2d, beta2d


def bert_self_output(x, w_t, b2d, g2d, beta2d, *, tm=512,
                     out_dtype=jnp.bfloat16, vmem_limit_bytes=None):
    """x: [B, S, 768] (f32 or bf16). w_t/b2d/g2d/beta2d: outputs of prepare_params().

    out_dtype=jnp.bfloat16 halves output HBM writeback; pass jnp.float32 to
    match the torch module's output dtype exactly.
    Tuning: tm=512 is safe on all generations at default scoped VMEM; sweep
    tm=1024 with vmem_limit_bytes ~24-28 MiB on v6e/v7x (budget against
    v7x's 64 MiB physical VMEM per core).
    """
    B, S, H = x.shape
    assert H == HIDDEN
    M = B * S

    # 8-row-aligned tile, capped so the grid has >= 2 steps whenever M > 8
    # (lets "parallel" shard row tiles across both v7x TensorCores).
    tm_cap = _round_up(max(pl.cdiv(M, 2), 1), 8)
    tm_eff = max(8, min(tm, tm_cap))
    grid_m = pl.cdiv(M, tm_eff)

    # No wrapper-side pad/cast: ragged tails use Pallas boundary-block masking
    # (rows are independent; padded tail rows are never written back).
    x2d = x.reshape(M, H)

    out2d = pl.pallas_call(
        bert_self_output_kernel,
        out_shape=jax.ShapeDtypeStruct((M, H), out_dtype),
        grid_spec=pltpu.PrefetchScalarGridSpec(
            num_scalar_prefetch=0,
            grid=(grid_m,),
            in_specs=[
                pl.BlockSpec((tm_eff, H), lambda i: (i, 0)),  # x row tile
                pl.BlockSpec((H, H), lambda i: (0, 0)),       # weight (resident)
                pl.BlockSpec((1, H), lambda i: (0, 0)),       # bias
                pl.BlockSpec((1, H), lambda i: (0, 0)),       # LN gamma
                pl.BlockSpec((1, H), lambda i: (0, 0)),       # LN beta
            ],
            out_specs=pl.BlockSpec((tm_eff, H), lambda i: (i, 0)),
        ),
        compiler_params=pltpu.CompilerParams(
            dimension_semantics=("parallel",),
            vmem_limit_bytes=vmem_limit_bytes,
        ),
    )(x2d, w_t, b2d, g2d, beta2d)

    return out2d.reshape(B, S, H)


def _reference(x, weight, bias, gamma, beta):
    y = x.reshape(-1, HIDDEN).astype(jnp.float32) @ weight.astype(jnp.float32).T
    y = y + bias.astype(jnp.float32)
    mu = y.mean(-1, keepdims=True)
    var = ((y - mu) ** 2).mean(-1, keepdims=True)
    out = ((y - mu) / jnp.sqrt(var + EPS)) * gamma + beta
    return out.reshape(x.shape)


if __name__ == "__main__":
    key = jax.random.PRNGKey(0)
    k_x, k_w, k_b, k_x2 = jax.random.split(key, 4)

    # Small shapes consistent with the module (hidden is fixed at 768).
    B, S = 2, 8
    x = jax.random.normal(k_x, (B, S, HIDDEN), dtype=jnp.float32)

    weight = jax.random.normal(k_w, (HIDDEN, HIDDEN), dtype=jnp.float32) * 0.02
    bias = jax.random.normal(k_b, (HIDDEN,), dtype=jnp.float32) * 0.02
    gamma = jnp.ones((HIDDEN,), dtype=jnp.float32)
    beta = jnp.zeros((HIDDEN,), dtype=jnp.float32)

    # One-time parameter prep (transpose + bf16 cast hoisted out of the call).
    w_t, b2d, g2d, beta2d = prepare_params(weight, bias, gamma, beta)

    out = jax.block_until_ready(bert_self_output(x, w_t, b2d, g2d, beta2d))
    ref = _reference(x, weight, bias, gamma, beta)
    # bf16 matmul operands + bf16 output with f32 accumulation/LN: loose tol.
    assert jnp.allclose(out.astype(jnp.float32), ref, atol=5e-2, rtol=5e-2), (
        "mismatch vs reference"
    )

    # Ragged row count (M = 10, not a multiple of the 8-row tile): exercises
    # Pallas boundary-block masking with no wrapper-side pad/slice.
    x_ragged = jax.random.normal(k_x2, (2, 5, HIDDEN), dtype=jnp.float32)
    out_ragged = jax.block_until_ready(
        bert_self_output(x_ragged, w_t, b2d, g2d, beta2d)
    )
    ref_ragged = _reference(x_ragged, weight, bias, gamma, beta)
    assert jnp.allclose(out_ragged.astype(jnp.float32), ref_ragged,
                        atol=5e-2, rtol=5e-2), "mismatch vs reference (ragged)"

    # bf16 activations from upstream: no cast pass anywhere.
    out_bf16_in = jax.block_until_ready(
        bert_self_output(x.astype(jnp.bfloat16), w_t, b2d, g2d, beta2d)
    )
    assert jnp.allclose(out_bf16_in.astype(jnp.float32), ref,
                        atol=7e-2, rtol=7e-2), "mismatch vs reference (bf16 in)"

    print("KERNEL_OK")
</pallas_src>

<mosaic_0001>
module attributes {stable_mosaic.version = 11 : i64} {
  func.func @bert_self_output_kernel(%arg0: i32, %arg1: memref<8x768xf32, #tpu.memory_space<vmem>>, %arg2: memref<768x768xbf16, #tpu.memory_space<vmem>>, %arg3: memref<1x768xf32, #tpu.memory_space<vmem>>, %arg4: memref<1x768xf32, #tpu.memory_space<vmem>>, %arg5: memref<1x768xf32, #tpu.memory_space<vmem>>, %arg6: memref<8x768xbf16, #tpu.memory_space<vmem>>) attributes {dimension_semantics = [#tpu.dimension_semantics<parallel>], iteration_bounds = array<i64: 2>, scalar_prefetch = 0 : i64, scratch_operands = 0 : i64, tpu.core_type = #tpu.core_type<tc>, window_params = [{transform_indices = @transform_0, window_bounds = array<i64: 8, 768>}, {pipeline_mode = #tpu.pipeline_mode<synchronous>, transform_indices = @transform_1, window_bounds = array<i64: 768, 768>}, {pipeline_mode = #tpu.pipeline_mode<synchronous>, transform_indices = @transform_2, window_bounds = array<i64: 1, 768>}, {pipeline_mode = #tpu.pipeline_mode<synchronous>, transform_indices = @transform_3, window_bounds = array<i64: 1, 768>}, {pipeline_mode = #tpu.pipeline_mode<synchronous>, transform_indices = @transform_4, window_bounds = array<i64: 1, 768>}, {transform_indices = @transform_5, window_bounds = array<i64: 8, 768>}]} {
    %c0 = arith.constant 0 : index
    %c0_0 = arith.constant 0 : index
    %0 = vector.load %arg1[%c0, %c0_0] : memref<8x768xf32, #tpu.memory_space<vmem>>, vector<8x768xf32>
    %1 = arith.truncf %0 : vector<8x768xf32> to vector<8x768xbf16>
    %c0_1 = arith.constant 0 : index
    %c0_2 = arith.constant 0 : index
    %2 = vector.load %arg2[%c0_1, %c0_2] : memref<768x768xbf16, #tpu.memory_space<vmem>>, vector<768x768xbf16>
    %cst = arith.constant dense<0.000000e+00> : vector<8x768xf32>
    %3 = tpu.matmul %1, %2, %cst {dimension_numbers = #tpu.dot_dimension_numbers<[1], [0], [0], [1], [0, 0, 1, 1], [], []>} : vector<8x768xbf16>, vector<768x768xbf16>, vector<8x768xf32> -> vector<8x768xf32>
    %c0_3 = arith.constant 0 : index
    %c0_4 = arith.constant 0 : index
    %4 = vector.load %arg3[%c0_3, %c0_4] : memref<1x768xf32, #tpu.memory_space<vmem>>, vector<1x768xf32>
    %5 = vector.broadcast %4 : vector<1x768xf32> to vector<8x768xf32>
    %6 = arith.addf %3, %5 : vector<8x768xf32>
    %cst_5 = arith.constant dense<0.000000e+00> : vector<8xf32>
    %7 = vector.multi_reduction <add>, %6, %cst_5 [1] : vector<8x768xf32> to vector<8xf32>
    %8 = vector.shape_cast %7 : vector<8xf32> to vector<8x1xf32>
    %cst_6 = arith.constant 7.680000e+02 : f32
    %9 = vector.broadcast %cst_6 : f32 to vector<8x1xf32>
    %10 = arith.divf %8, %9 : vector<8x1xf32>
    %11 = arith.mulf %6, %6 : vector<8x768xf32>
    %cst_7 = arith.constant dense<0.000000e+00> : vector<8xf32>
    %12 = vector.multi_reduction <add>, %11, %cst_7 [1] : vector<8x768xf32> to vector<8xf32>
    %13 = vector.shape_cast %12 : vector<8xf32> to vector<8x1xf32>
    %cst_8 = arith.constant 7.680000e+02 : f32
    %14 = vector.broadcast %cst_8 : f32 to vector<8x1xf32>
    %15 = arith.divf %13, %14 : vector<8x1xf32>
    %16 = arith.mulf %10, %10 : vector<8x1xf32>
    %17 = arith.subf %15, %16 : vector<8x1xf32>
    %cst_9 = arith.constant 0.000000e+00 : f32
    %18 = vector.broadcast %cst_9 : f32 to vector<8x1xf32>
    %19 = arith.maximumf %17, %18 : vector<8x1xf32>
    %cst_10 = arith.constant 9.99999996E-13 : f32
    %20 = vector.broadcast %cst_10 : f32 to vector<8x1xf32>
    %21 = arith.addf %19, %20 : vector<8x1xf32>
    %22 = math.rsqrt %21 : vector<8x1xf32>
    %23 = vector.broadcast %10 : vector<8x1xf32> to vector<8x768xf32>
    %24 = arith.subf %6, %23 : vector<8x768xf32>
    %c0_11 = arith.constant 0 : index
    %c0_12 = arith.constant 0 : index
    %25 = vector.load %arg4[%c0_11, %c0_12] : memref<1x768xf32, #tpu.memory_space<vmem>>, vector<1x768xf32>
    %26 = vector.broadcast %22 : vector<8x1xf32> to vector<8x768xf32>
    %27 = vector.broadcast %25 : vector<1x768xf32> to vector<8x768xf32>
    %28 = arith.mulf %26, %27 : vector<8x768xf32>
    %29 = arith.mulf %24, %28 : vector<8x768xf32>
    %c0_13 = arith.constant 0 : index
    %c0_14 = arith.constant 0 : index
    %30 = vector.load %arg5[%c0_13, %c0_14] : memref<1x768xf32, #tpu.memory_space<vmem>>, vector<1x768xf32>
    %31 = vector.broadcast %30 : vector<1x768xf32> to vector<8x768xf32>
    %32 = arith.addf %29, %31 : vector<8x768xf32>
    %33 = arith.truncf %32 : vector<8x768xf32> to vector<8x768xbf16>
    %c0_15 = arith.constant 0 : index
    %c0_16 = arith.constant 0 : index
    %34 = vector.load %arg6[%c0_15, %c0_16] : memref<8x768xbf16, #tpu.memory_space<vmem>>, vector<8x768xbf16>
    tpu.vector_store %arg6[%c0_15, %c0_16], %33 {strides = array<i32>} : memref<8x768xbf16, #tpu.memory_space<vmem>>, vector<8x768xbf16>,
    return
  }
  func.func @transform_0(%arg0: i32) -> (i32, i32) {
    %c0_i32 = arith.constant 0 : i32
    %c0_i32_0 = arith.constant 0 : i32
    return %arg0, %c0_i32 : i32, i32
  }
  func.func @transform_1(%arg0: i32) -> (i32, i32) {
    %c0_i32 = arith.constant 0 : i32
    %c0_i32_0 = arith.constant 0 : i32
    %c0_i32_1 = arith.constant 0 : i32
    return %c0_i32, %c0_i32_0 : i32, i32
  }
  func.func @transform_2(%arg0: i32) -> (i32, i32) {
    %c0_i32 = arith.constant 0 : i32
    %c0_i32_0 = arith.constant 0 : i32
    %c0_i32_1 = arith.constant 0 : i32
    return %c0_i32, %c0_i32_0 : i32, i32
  }
  func.func @transform_3(%arg0: i32) -> (i32, i32) {
    %c0_i32 = arith.constant 0 : i32
    %c0_i32_0 = arith.constant 0 : i32
    %c0_i32_1 = arith.constant 0 : i32
    return %c0_i32, %c0_i32_0 : i32, i32
  }
  func.func @transform_4(%arg0: i32) -> (i32, i32) {
    %c0_i32 = arith.constant 0 : i32
    %c0_i32_0 = arith.constant 0 : i32
    %c0_i32_1 = arith.constant 0 : i32
    return %c0_i32, %c0_i32_0 : i32, i32
  }
  func.func @transform_5(%arg0: i32) -> (i32, i32) {
    %c0_i32 = arith.constant 0 : i32
    %c0_i32_0 = arith.constant 0 : i32
    return %arg0, %c0_i32 : i32, i32
  }
}

</mosaic_0001>

<bundles_post_ra>
// kernel: tpu_custom_call.1
= control target key start
LH: loop header
LB: loop body
LE: loop exit
PB: predicated region body
PF: predicated region fallthrough
CT: control target
= control target key end

     0   :  { %10 = vsyncpa [#allocation3], 0  ;;  %s4189_s0 = inlined_call_operand.hbm [shape: f32[16,768], index: 0, kind: input, shape index: {}]   ;;  %s4190_s1 = inlined_call_operand.hbm [shape: bf16[768,768], index: 1, kind: input, shape index: {}]   ;;  %s4191_s2 = inlined_call_operand.hbm [shape: f32[1,768], index: 2, kind: input, shape index: {}]   ;;  %s4192_s3 = inlined_call_operand.hbm [shape: f32[1,768], index: 3, kind: input, shape index: {}]   ;;  %s4193_s4 = inlined_call_operand.hbm [shape: f32[1,768], index: 4, kind: input, shape index: {}]   ;;  %s4194_s5 = inlined_call_operand.hbm [shape: bf16[16,768], index: 5, kind: output, shape index: {}]  }
   0x1   :  { %12 = vsyncpa [#allocation3 + $0x1], 0 }
   0x2   :  { %13 = vsyncpa [#allocation6], 0 }
   0x3   :  { %14 = vsyncpa [#allocation9], 0 }
   0x4   :  { %15 = vsyncpa [#allocation4], 0 }
   0x5   :  { %17 = vsyncpa [#allocation4 + $0x1], 0  ;;  %s3822_s18 = smov 0   ;;  %s3824_s19 = smov 0  }
   0x6   :  { %s3826_s20 = smov 0   ;;  %s3828_s21 = smov 0  }
   0x7 LB: > { %s3784_s22 = smov [#allocation5]   ;;  %s3843_s24 = sadd.s32 4294967295, %s3782_s21   ;;  %s3782_s21 = sphi %s3828_s21, %s4217_s21   ;;  %s3778_s20 = sphi %s3826_s20, %s4216_s20   ;;  %s3774_s19 = sphi %s3824_s19, %s4215_s19   ;;  %s3770_s18 = sphi %s3822_s18, %s4214_s18  }
   0x8   : > { %s176_s23 = sshll.u32 %s3784_s22, 4  ;;  %p2701_p0 = scmp.ge.s32.totalorder %s3782_s21, 1  ;;  %s3848_s23 = int_to_ptr.vmem [resolvable:$true] %s176_s23 }
   0x9   : > { %p4195_p1 = scmp.eq.s32.totalorder %s3843_s24, 0  ;;  %p164_p2 = scmp.lt.s32.totalorder %s3782_s21, 3 }
   0xa   : > { %s3785_s26 = smov [#allocation8]   ;;  %s3786_s29 = smov [#allocation7]  }
   0xb   : > { %p3850_p3 = pnand %p2701_p0, %p164_p2  ;;  %s201_s27 = sshll.u32 %s3785_s26, 4  ;;  %s3863_s27 = int_to_ptr.vmem [resolvable:$true] %s201_s27 }
   0xc   : > { %s190_s30 = sshll.u32 %s3786_s29, 4  ;;  %s3566_s8 = scalar_lea.hbm %s4190_s1, 36864  ;;  %s3865_s30 = int_to_ptr.vmem [resolvable:$true] %s190_s30 }
   0xd   : > { %s4198_s25 = scalar_select %p3850_p3, 1, 0 }
   0xe   : > { %p3063_p5 = pneg %p3850_p3  ;;  %p3567_p7 = scmp.ne.s32.totalorder %s4190_s1, %s3566_s8 }
   0xf   : > { %p3573_p11 = scmp.lt.u32.totalorder %s3566_s8, %s4190_s1 }
  0x10   : > { %p3859_p6 = pnand %p3063_p5, %p4195_p1 }
  0x12   : > { %p3875_p8 = pneg %p3859_p6 }
  0x14   : > { %p3569_p9 = pnand %p3875_p8, %p3567_p7 }
  0x16   : > { %p3570_p10 = pneg %p3569_p9 }
  0x18   : > { %p3575_p12 = pnand %p3573_p11, %p3570_p10 }
  0x1a   : > { %3578 = shalt.err (!%p3575_p12)
}
  0x1b   : > { %s3579_s14 = scalar_lea.vmem %s3848_s23, 36864  ;;  %p3587_p5 = scmp.lt.s32.totalorder %s3848_s23, %s3848_s23 }
  0x1c   : > { %p3580_p13 = scmp.ne.s32.totalorder %s3848_s23, %s3579_s14  ;;  %p3588_p4 = scmp.lt.s32.totalorder %s3579_s14, %s3579_s14 }
  0x1e   : > { %p3582_p0 = pnand %p3580_p13, %p3875_p8  ;;  %p3589_p7 = por %p3588_p4, %p3587_p5 }
  0x20   : > { %p3583_p2 = pneg %p3582_p0 }
  0x22   : > { %p3590_p9 = pnand %p3589_p7, %p3583_p2 }
  0x24   : > { %3593 = shalt.err (!%p3590_p9)
}
  0x25   : > { %s3787_s15 = smov 384   ;;  %s3788_s16 = smov 24  }
  0x26   : > { %3066 = dma.hbm_to_vmem [thread:$0]  (!%p3859_p6), %s4190_s1, 36864, %s3848_s23, [#allocation6], %s3787_s15, %s3787_s15, %s3788_s16  }
  0x27   : > { %s3594_s6 = scalar_lea.hbm %s4192_s3, 96 }
  0x28   : > { %p3595_p4 = scmp.ne.s32.totalorder %s4192_s3, %s3594_s6  ;;  %p3601_p12 = scmp.lt.u32.totalorder %s3594_s6, %s4192_s3 }
  0x2a   : > { %p3597_p10 = pnand %p3595_p4, %p3875_p8 }
  0x2c   : > { %p3598_p11 = pneg %p3597_p10 }
  0x2e   : > { %p3603_p13 = pnand %p3601_p12, %p3598_p11 }
  0x30   : > { %3606 = shalt.err (!%p3603_p13)
}
  0x31   : > { %s3607_s23 = scalar_lea.vmem %s3863_s27, 96  ;;  %p3615_p7 = scmp.lt.s32.totalorder %s3863_s27, %s3863_s27 }
  0x32   : > { %p3608_p0 = scmp.ne.s32.totalorder %s3863_s27, %s3607_s23  ;;  %p3616_p9 = scmp.lt.s32.totalorder %s3607_s23, %s3607_s23 }
  0x34   : > { %p3610_p2 = pnand %p3608_p0, %p3875_p8  ;;  %p3617_p4 = por %p3616_p9, %p3615_p7 }
  0x36   : > { %p3611_p5 = pneg %p3610_p2 }
  0x38   : > { %p3618_p10 = pnand %p3617_p4, %p3611_p5 }
  0x3a   : > { %3621 = shalt.err (!%p3618_p10)
}
  0x3b   : > { %3072 = dma.hbm_to_vmem [thread:$0]  (!%p3859_p6), %s4192_s3, 96, %s3863_s27, [#allocation9]  }
  0x3c   : > { %s3622_s16 = scalar_lea.hbm %s4191_s2, 96 }
  0x3d   : > { %p3623_p11 = scmp.ne.s32.totalorder %s4191_s2, %s3622_s16  ;;  %p3629_p0 = scmp.lt.u32.totalorder %s3622_s16, %s4191_s2 }
  0x3f   : > { %p3625_p12 = pnand %p3623_p11, %p3875_p8 }
  0x41   : > { %p3626_p13 = pneg %p3625_p12 }
  0x43   : > { %p3631_p2 = pnand %p3629_p0, %p3626_p13 }
  0x45   : > { %3634 = shalt.err (!%p3631_p2)
}
  0x46   : > { %s3635_s27 = scalar_lea.vmem %s3865_s30, 96  ;;  %p3643_p4 = scmp.lt.s32.totalorder %s3865_s30, %s3865_s30 }
  0x47   : > { %p3636_p5 = scmp.ne.s32.totalorder %s3865_s30, %s3635_s27  ;;  %p3644_p10 = scmp.lt.s32.totalorder %s3635_s27, %s3635_s27 }
  0x49   : > { %p3638_p7 = pnand %p3636_p5, %p3875_p8  ;;  %p3645_p11 = por %p3644_p10, %p3643_p4 }
  0x4b   : > { %p3639_p9 = pneg %p3638_p7 }
  0x4d   : > { %p3646_p12 = pnand %p3645_p11, %p3639_p9 }
  0x4f   : > { %3649 = shalt.err (!%p3646_p12)
}
  0x50   : > { %3069 = dma.hbm_to_vmem [thread:$0]  (!%p3859_p6), %s4191_s2, 96, %s3865_s30, [#allocation6]  }
  0x51   : > { %s3789_s8 = smov [#allocation10]   ;;  %s3650_s12 = scalar_lea.hbm %s4193_s4, 96 }
  0x52   : > { %s212_s9 = sshll.u32 %s3789_s8, 4  ;;  %p3651_p13 = scmp.ne.s32.totalorder %s4193_s4, %s3650_s12  ;;  %s213_s9 = int_to_ptr.vmem [resolvable:$true] %s212_s9 }
  0x53   : > { %p3657_p5 = scmp.lt.u32.totalorder %s3650_s12, %s4193_s4 }
  0x54   : > { %p3653_p0 = pnand %p3651_p13, %p3875_p8 }
  0x56   : > { %p3654_p2 = pneg %p3653_p0 }
  0x58   : > { %p3659_p7 = pnand %p3657_p5, %p3654_p2 }
  0x5a   : > { %3662 = shalt.err (!%p3659_p7)
}
  0x5b   : > { %s3663_s30 = scalar_lea.vmem %s213_s9, 96  ;;  %p3671_p11 = scmp.lt.s32.totalorder %s213_s9, %s213_s9 }
  0x5c   : > { %p3664_p9 = scmp.ne.s32.totalorder %s213_s9, %s3663_s30  ;;  %p3672_p12 = scmp.lt.s32.totalorder %s3663_s30, %s3663_s30 }
  0x5e   : > { %p3666_p4 = pnand %p3664_p9, %p3875_p8  ;;  %p3673_p1 = por %p3672_p12, %p3671_p11 }
  0x60   : > { %p3667_p10 = pneg %p3666_p4 }
  0x62   : > { %p3674_p3 = pnand %p3673_p1, %p3667_p10 }
  0x64   : > { %3677 = shalt.err (!%p3674_p3)
}
  0x65   : > { %3075 = dma.hbm_to_vmem [thread:$0]  (!%p3859_p6), %s4193_s4, 96, %s213_s9, [#allocation9]  }
  0x66   : > { %s2700_s11 = sadd.s32 4294967294, %s3782_s21   ;;  %s3962_s28 = sadd.s32 1, %s3782_s21  }
  0x67   : > { %s27_s26 = ssub.s32 %s3782_s21, %s3962_s28  ;;  %s30_s29 = sadd.s32 1, %s3778_s20 }
  0x68   : > { %p28_p1 = scmp.eq.s32.totalorder %s27_s26, 0  ;;  %p37_p3 = scmp.ne.s32.totalorder %s3778_s20, %s3774_s19 }
  0x69   : > { %p38_p8 = scmp.eq.s32.totalorder %s3782_s21, 0  ;;  %p43_p13 = scmp.ne.s32.totalorder %s3774_s19, %s3770_s18 }
  0x6a   : > { %s3973_s27 = scalar_select %p28_p1, %s3778_s20, %s30_s29  }
  0x6b   : > { %p39_p0 = por %p38_p8, %p37_p3  ;;  %p4201_p2 = scmp.eq.s32.totalorder %s3843_s24, 0 }
  0x6c   : > { %p151_p6 = scmp.eq.s32.totalorder %s3843_s24, 1  ;;  %p157_p7 = scmp.eq.s32.totalorder %s2700_s11, 1 }
  0x6d   : > { %p3977_p5 = por %p4201_p2, %p43_p13  ;;  %p3088_p9 = scmp.lt.s32.totalorder %s3782_s21, 2 }
  0x6e   : > { %s223_s7 = sand.u32 1, %s3778_s20   ;;  %p3984_p4 = por %p151_p6, %p37_p3 }
  0x6f   : > { %p3988_p10 = por %p157_p7, %p43_p13  ;;  %s3038_s10 = smul.u32 48, %s223_s7 }
  0x70   : > { %s4203_s8 = scalar_select %p3984_p4, 1, 0 }
  0x71   : > { %s4204_s9 = scalar_select %p3988_p10, 1, 0 }
  0x72   : > { %s3039_s23 = smul.u32 768, %s3782_s21  ;;  %p3993_p11 = pnand %p3088_p9, %p39_p0 }
  0x73   : > { %s227_s16 = scalar_lea.vmem [#allocation2], %s3038_s10  ;;  %s224_s17 = scalar_lea.sflag [#allocation3], %s223_s7 }
  0x74   : > { %s4000_s15 = scalar_lea.hbm %s4189_s0, %s3039_s23  ;;  %s235_s30 = sshll.u32 %s227_s16, 4  ;;  %s4002_s30 = int_to_ptr.vmem [resolvable:$true] %s235_s30 }
  0x75   : > { %s3678_s22 = scalar_lea.hbm %s4000_s15, 768  ;;  %p3680_p1 = pneg %p3993_p11 }
  0x76   : > { %p3679_p12 = scmp.ne.s32.totalorder %s4000_s15, %s3678_s22  ;;  %s3683_s29 = scalar_lea.hbm %s4189_s0, 1536 }
  0x77   : > { %p3684_p13 = scmp.lt.u32.totalorder %s4000_s15, %s4189_s0  ;;  %p3685_p0 = scmp.lt.u32.totalorder %s3683_s29, %s3678_s22 }
  0x78   : > { %p3681_p3 = pnand %p3680_p1, %p3679_p12  ;;  %p3687_p6 = scmp.lt.u32.totalorder %s3678_s22, %s4000_s15 }
  0x79   : > { %p3686_p2 = por %p3685_p0, %p3684_p13 }
  0x7a   : > { %p3682_p8 = pneg %p3681_p3 }
  0x7b   : > { %p3688_p7 = por %p3687_p6, %p3686_p2 }
  0x7d   : > { %p3689_p9 = pnand %p3688_p7, %p3682_p8 }
  0x7f   : > { %3692 = shalt.err (!%p3689_p9)
}
  0x80   : > { %s3693_s7 = scalar_lea.vmem %s4002_s30, 768  ;;  %s3790_s10 = smov [#allocation2]  }
  0x81   : > { %p3694_p12 = scmp.ne.s32.totalorder %s4002_s30, %s3693_s7  ;;  %s3698_s14 = sshll.u32 %s3790_s10, 4  ;;  %s3699_s14 = int_to_ptr.vmem [resolvable:$false] %s3698_s14 }
  0x82   : > { %s3700_s16 = scalar_lea.vmem %s3699_s14, 1536  ;;  %p3701_p4 = scmp.lt.s32.totalorder %s4002_s30, %s3699_s14 }
  0x83   : > { %p3696_p3 = pnand %p3694_p12, %p3680_p1  ;;  %p3702_p13 = scmp.lt.s32.totalorder %s3700_s16, %s3693_s7 }
  0x85   : > { %p3697_p10 = pneg %p3696_p3  ;;  %p3703_p0 = por %p3702_p13, %p3701_p4 }
  0x87   : > { %p3704_p2 = pnand %p3703_p0, %p3697_p10 }
  0x89   : > { %3707 = shalt.err (!%p3704_p2)
}
  0x8a   : > { %3079 = dma.hbm_to_vmem [thread:$0]  (!%p3993_p11), %s4000_s15, 768, %s4002_s30, %s224_s17  }
  0x8b   : > { %p4206_p8 = scmp.ne.s32.totalorder %s4198_s25, 0 }
  0x8c   : > { %s4032_s22 = sand.u32 (!%p4206_p8), 1, %s3774_s19  }
  0x8d   : > { %244 = sbr.rel (%p4206_p8) target bundleno = 883 (0x373), region = 40  ;;  %s247_s26 = scalar_lea.sflag (!%p4206_p8), [#allocation3], %s4032_s22 }
  0x8e   : > { %s3040_s11 = smul.u32 (!%p4206_p8), 48, %s4032_s22 }
  0x90   : > { %s4036_s29 = scalar_lea.vmem (!%p4206_p8), [#allocation2], %s3040_s11 }
  0x94   : > { %3753 = dma.done.wait (%p3977_p5), %s247_s26, 768  }
  0x95   : > { %3755 = vsyncadd (%p3977_p5), %s247_s26, 4294966528  ;;  %p4207_p4 = scmp.eq.s32.totalorder %s3843_s24, 0 }
  0x97   : > { %3757 = dma.done.wait (%p4207_p4), [#allocation6], 36960   ;;  %p4208_p10 = pmov %p4207_p4 }
  0x98   : > { %p4209_p11 = pmov %p4207_p4 }
  0x99   : > { %3759 = vsyncadd (%p4208_p10), [#allocation6], 4294930336 }
  0x9a   : > { %3761 = dma.done.wait (%p4209_p11), [#allocation9], 192   ;;  %p4210_p1 = pmov %p4207_p4 }
  0x9b   : > { %v3132_v0 = vld [vmem:[#allocation5 + $0x4] ss:$24 sps:$4 sm:$0xff]   ;;  %v3136_v2 = vld [vmem:[#allocation5] ss:$24 sps:$4 sm:$0xff]   ;;  %v3138_v4 = vld [vmem:[#allocation5 + $0x34] ss:$24 sps:$4 sm:$0xff]  }
  0x9c   : > { %3763 = vsyncadd (%p4210_p1), [#allocation9], 4294967104  ;;  %v3134_v1 = vld [vmem:[#allocation5 + $0x304] ss:$24 sps:$4 sm:$0xff]   ;;  %2065 = vmatprep.subr.bf16.mxu1 %v3132_v0  ;;  %v3137_v3 = vld [vmem:[#allocation5 + $0x300] ss:$24 sps:$4 sm:$0xff]  }
  0x9d   : > { %2106 = vmatprep.subr.bf16.mxu0 %v3134_v1  ;;  %2066 = vmatpush1.bf16.msra.mxu1 %v3136_v2  ;;  %v3140_v5 = vld [vmem:[#allocation5 + $0x334] ss:$24 sps:$4 sm:$0xff]   ;;  %v3142_v6 = vld [vmem:[#allocation5 + $0x30] ss:$24 sps:$4 sm:$0xff]   ;;  %v3144_v8 = vld [vmem:[#allocation5 + $0x64] ss:$24 sps:$4 sm:$0xff]  }
  0x9e   : > { %2107 = vmatpush1.bf16.msra.mxu0 %v3137_v3  ;;  %2067 = vmatprep.subr.bf16.mxu1 %v3138_v4  ;;  %v3143_v7 = vld [vmem:[#allocation5 + $0x330] ss:$24 sps:$4 sm:$0xff]   ;;  %v3146_v9 = vld [vmem:[#allocation5 + $0x364] ss:$24 sps:$4 sm:$0xff]   ;;  %v3148_v10 = vld [vmem:[#allocation5 + $0x60] ss:$24 sps:$4 sm:$0xff]  }
  0x9f   : > { %2108 = vmatprep.subr.bf16.mxu0 %v3140_v5  ;;  %v3149_v11 = vld [vmem:[#allocation5 + $0x360] ss:$24 sps:$4 sm:$0xff]   ;;  %v3150_v12 = vld [vmem:[#allocation5 + $0x94] ss:$24 sps:$4 sm:$0xff]   ;;  %v3154_v14 = vld [vmem:[#allocation5 + $0x90] ss:$24 sps:$4 sm:$0xff]  }
  0xa0   : > { %v3152_v13 = vld [vmem:[#allocation5 + $0x394] ss:$24 sps:$4 sm:$0xff]   ;;  %v3155_v15 = vld [vmem:[#allocation5 + $0x390] ss:$24 sps:$4 sm:$0xff]   ;;  %v3156_v16 = vld [vmem:[#allocation5 + $0xc4] ss:$24 sps:$4 sm:$0xff]  }
  0xa1   : > { %2068 = vmatpush1.bf16.msra.mxu1 %v3142_v6  ;;  %v3158_v17 = vld [vmem:[#allocation5 + $0x3c4] ss:$24 sps:$4 sm:$0xff]   ;;  %v3160_v18 = vld [vmem:[#allocation5 + $0xc0] ss:$24 sps:$4 sm:$0xff]   ;;  %v3162_v20 = vld [vmem:[#allocation5 + $0xf4] ss:$24 sps:$4 sm:$0xff]  }
  0xa2   : > { %2109 = vmatpush1.bf16.msra.mxu0 %v3143_v7  ;;  %2069 = vmatprep.subr.bf16.mxu1 %v3144_v8  ;;  %v3161_v19 = vld [vmem:[#allocation5 + $0x3c0] ss:$24 sps:$4 sm:$0xff]   ;;  %v3164_v21 = vld [vmem:[#allocation5 + $0x3f4] ss:$24 sps:$4 sm:$0xff]   ;;  %v3166_v22 = vld [vmem:[#allocation5 + $0xf0] ss:$24 sps:$4 sm:$0xff]  }
  0xa3   : > { %2110 = vmatprep.subr.bf16.mxu0 %v3146_v9  ;;  %v3167_v23 = vld [vmem:[#allocation5 + $0x3f0] ss:$24 sps:$4 sm:$0xff]   ;;  %v3168_v24 = vld [vmem:[#allocation5 + $0x124] ss:$24 sps:$4 sm:$0xff]   ;;  %v3172_v26 = vld [vmem:[#allocation5 + $0x120] ss:$24 sps:$4 sm:$0xff]  }
  0xa4   : > { %v3170_v25 = vld [vmem:[#allocation5 + $0x424] ss:$24 sps:$4 sm:$0xff]   ;;  %v3173_v27 = vld [vmem:[#allocation5 + $0x420] ss:$24 sps:$4 sm:$0xff]   ;;  %v3174_v28 = vld [vmem:[#allocation5 + $0x154] ss:$24 sps:$4 sm:$0xff]  }
  0xa5   : > { %2070 = vmatpush1.bf16.msra.mxu1 %v3148_v10  ;;  %v3176_v29 = vld [vmem:[#allocation5 + $0x454] ss:$24 sps:$4 sm:$0xff]   ;;  %v3178_v30 = vld [vmem:[#allocation5 + $0x150] ss:$24 sps:$4 sm:$0xff]   ;;  %v3180_v32 = vld [vmem:[#allocation5 + $0x184] ss:$24 sps:$4 sm:$0xff]  }
  0xa6   : > { %2111 = vmatpush1.bf16.msra.mxu0 %v3149_v11  ;;  %2071 = vmatprep.subr.bf16.mxu1 %v3150_v12  ;;  %v3179_v31 = vld [vmem:[#allocation5 + $0x450] ss:$24 sps:$4 sm:$0xff]   ;;  %v3182_v33 = vld [vmem:[#allocation5 + $0x484] ss:$24 sps:$4 sm:$0xff]   ;;  %v3184_v34 = vld [vmem:[#allocation5 + $0x180] ss:$24 sps:$4 sm:$0xff]  }
  0xa7   : > { %2112 = vmatprep.subr.bf16.mxu0 %v3152_v13  ;;  %v3185_v35 = vld [vmem:[#allocation5 + $0x480] ss:$24 sps:$4 sm:$0xff]   ;;  %v3186_v36 = vld [vmem:[#allocation5 + $0x1b4] ss:$24 sps:$4 sm:$0xff]   ;;  %v3190_v38 = vld [vmem:[#allocation5 + $0x1b0] ss:$24 sps:$4 sm:$0xff]  }
  0xa8   : > { %v3188_v37 = vld [vmem:[#allocation5 + $0x4b4] ss:$24 sps:$4 sm:$0xff]   ;;  %v3191_v39 = vld [vmem:[#allocation5 + $0x4b0] ss:$24 sps:$4 sm:$0xff]   ;;  %v3192_v40 = vld [vmem:[#allocation5 + $0x1e4] ss:$24 sps:$4 sm:$0xff]  }
  0xa9   : > { %2072 = vmatpush1.bf16.msra.mxu1 %v3154_v14  ;;  %v3194_v41 = vld [vmem:[#allocation5 + $0x4e4] ss:$24 sps:$4 sm:$0xff]   ;;  %v3196_v42 = vld [vmem:[#allocation5 + $0x1e0] ss:$24 sps:$4 sm:$0xff]   ;;  %v3198_v44 = vld [vmem:[#allocation5 + $0x214] ss:$24 sps:$4 sm:$0xff]  }
  0xaa   : > { %2113 = vmatpush1.bf16.msra.mxu0 %v3155_v15  ;;  %2073 = vmatprep.subr.bf16.mxu1 %v3156_v16  ;;  %v3197_v43 = vld [vmem:[#allocation5 + $0x4e0] ss:$24 sps:$4 sm:$0xff]   ;;  %v3200_v45 = vld [vmem:[#allocation5 + $0x514] ss:$24 sps:$4 sm:$0xff]   ;;  %v3202_v49 = vld [vmem:[#allocation5 + $0x210] ss:$24 sps:$4 sm:$0xff]  }
  0xab   : > { %2114 = vmatprep.subr.bf16.mxu0 %v3158_v17  ;;  %v294_v46 = vld [vmem:[%s4036_s29 + $0x8] sm:$0xff]  ;;  %v296_v48 = vld [vmem:[%s4036_s29 + $0x18] sm:$0xff]  ;;  %v293_v5 = vld [vmem:[%s4036_s29] sm:$0xff]  ;;  %s3041_s25 = smul.u32 24, %s4032_s22  ;;  %p4211_p6 = scmp.ne.s32.totalorder %s4203_s8, 0 }
  0xac   : > { %v4051_v47 = vpack.c.bf16 %v294_v46, %v294_v46  ;;  %v3203_v50 = vld [vmem:[#allocation5 + $0x510] ss:$24 sps:$4 sm:$0xff]   ;;  %v4054_v51 = vpack.c.bf16 %v296_v48, %v296_v48  ;;  %v3204_v52 = vld [vmem:[#allocation5 + $0x244] ss:$24 sps:$4 sm:$0xff]   ;;  %v3208_v54 = vld [vmem:[#allocation5 + $0x240] ss:$24 sps:$4 sm:$0xff]   ;;  %v4060_v10 = vpack.c.bf16 %v293_v5, %v293_v5 }
  0xad   : > { %2074 = vmatpush1.bf16.msra.mxu1 %v3160_v18  ;;  %v3206_v53 = vld [vmem:[#allocation5 + $0x544] ss:$24 sps:$4 sm:$0xff]   ;;  %v3209_v55 = vld [vmem:[#allocation5 + $0x540] ss:$24 sps:$4 sm:$0xff]   ;;  %v3210_v56 = vld [vmem:[#allocation5 + $0x274] ss:$24 sps:$4 sm:$0xff]  }
  0xae   : > { %2115 = vmatpush1.bf16.msra.mxu0 %v3161_v19  ;;  %2075 = vmatprep.subr.bf16.mxu1 %v3162_v20  ;;  %v3212_v57 = vld [vmem:[#allocation5 + $0x574] ss:$24 sps:$4 sm:$0xff]   ;;  %v3214_v58 = vld [vmem:[#allocation5 + $0x270] ss:$24 sps:$4 sm:$0xff]   ;;  %v3216_v60 = vld [vmem:[#allocation5 + $0x2a4] ss:$24 sps:$4 sm:$0xff]  }
  0xaf   : > { %2116 = vmatprep.subr.bf16.mxu0 %v3164_v21  ;;  %2097 = vmatprep.mubr.bf16.mxu1 %v4051_v47  ;;  %v3215_v59 = vld [vmem:[#allocation5 + $0x570] ss:$24 sps:$4 sm:$0xff]   ;;  %v3218_v61 = vld [vmem:[#allocation5 + $0x5a4] ss:$24 sps:$4 sm:$0xff]   ;;  %v3220_v62 = vld [vmem:[#allocation5 + $0x2a0] ss:$24 sps:$4 sm:$0xff]  }
  0xb0   : > { %2138 = vmatprep.mubr.bf16.mxu0 %v4054_v51  ;;  %v3221_v63 = vld [vmem:[#allocation5 + $0x5a0] ss:$24 sps:$4 sm:$0xff]   ;;  %v3222_v0 = vld [vmem:[#allocation5 + $0x2d4] ss:$24 sps:$4 sm:$0xff]   ;;  %v3226_v2 = vld [vmem:[#allocation5 + $0x2d0] ss:$24 sps:$4 sm:$0xff]  }
  0xb1   : > { %2076 = vmatpush1.bf16.msra.mxu1 %v3166_v22  ;;  %v3224_v1 = vld [vmem:[#allocation5 + $0x5d4] ss:$24 sps:$4 sm:$0xff]   ;;  %v3227_v3 = vld [vmem:[#allocation5 + $0x5d0] ss:$24 sps:$4 sm:$0xff]   ;;  %v3230_v4 = vld [vmem:[#allocation5 + $0x604] ss:$24 sps:$4 sm:$0xff]  }
  0xb2   : > { %2117 = vmatpush1.bf16.msra.mxu0 %v3167_v23  ;;  %2077 = vmatprep.subr.bf16.mxu1 %v3168_v24  ;;  %v295_v6 = vld [vmem:[%s4036_s29 + $0x10] sm:$0xff]  ;;  %s3042_s6 = smul.u32 384, %s3843_s24  ;;  %s292_s12 = scalar_lea.vmem [#allocation11], %s3041_s25 }
  0xb3   : > { %2118 = vmatprep.subr.bf16.mxu0 %v3170_v25  ;;  %v3233_v7 = vld [vmem:[#allocation5 + $0xc] ss:$24 sps:$4 sm:$0xff]   ;;  %v3228_v8 = vld [vmem:[#allocation5 + $0x600] ss:$24 sps:$4 sm:$0xff]   ;;  %v4062_v11 = vpack.c.bf16 %v295_v6, %v295_v6  ;;  %v3239_v13 = vld [vmem:[#allocation5 + $0x3c] ss:$24 sps:$4 sm:$0xff]  }
  0xb4   : > { %v3231_v9 = vld [vmem:[#allocation5 + $0x8] ss:$24 sps:$4 sm:$0xff]   ;;  %v3236_v12 = vld [vmem:[#allocation5 + $0x634] ss:$24 sps:$4 sm:$0xff]   ;;  %v3237_v15 = vld [vmem:[#allocation5 + $0x38] ss:$24 sps:$4 sm:$0xff]   ;;  %s4145_s23 = scalar_lea.hbm %s4194_s5, %s3042_s6 }
  0xb5   : > { %2078 = vmatpush1.bf16.msra.mxu1 %v3172_v26  ;;  %v3234_v14 = vld [vmem:[#allocation5 + $0x630] ss:$24 sps:$4 sm:$0xff]   ;;  %v3242_v16 = vld [vmem:[#allocation5 + $0x664] ss:$24 sps:$4 sm:$0xff]   ;;  %v3240_v18 = vld [vmem:[#allocation5 + $0x660] ss:$24 sps:$4 sm:$0xff]  }
  0xb6   : > { %2119 = vmatpush1.bf16.msra.mxu0 %v3173_v27  ;;  %2079 = vmatprep.subr.bf16.mxu1 %v3174_v28  ;;  %v3245_v17 = vld [vmem:[#allocation5 + $0x6c] ss:$24 sps:$4 sm:$0xff]   ;;  %v3243_v19 = vld [vmem:[#allocation5 + $0x68] ss:$24 sps:$4 sm:$0xff]   ;;  %v3251_v21 = vld [vmem:[#allocation5 + $0x9c] ss:$24 sps:$4 sm:$0xff]  }
  0xb7   : > { %2120 = vmatprep.subr.bf16.mxu0 %v3176_v29  ;;  %v3248_v20 = vld [vmem:[#allocation5 + $0x694] ss:$24 sps:$4 sm:$0xff]   ;;  %v3246_v22 = vld [vmem:[#allocation5 + $0x690] ss:$24 sps:$4 sm:$0xff]   ;;  %v3254_v24 = vld [vmem:[#allocation5 + $0x6c4] ss:$24 sps:$4 sm:$0xff]  }
  0xb8   : > { %v3249_v23 = vld [vmem:[#allocation5 + $0x98] ss:$24 sps:$4 sm:$0xff]   ;;  %v3257_v25 = vld [vmem:[#allocation5 + $0xcc] ss:$24 sps:$4 sm:$0xff]   ;;  %v3255_v27 = vld [vmem:[#allocation5 + $0xc8] ss:$24 sps:$4 sm:$0xff]  }
  0xb9   : > { %2080 = vmatpush1.bf16.msra.mxu1 %v3178_v30  ;;  %v3252_v26 = vld [vmem:[#allocation5 + $0x6c0] ss:$24 sps:$4 sm:$0xff]   ;;  %v3260_v28 = vld [vmem:[#allocation5 + $0x6f4] ss:$24 sps:$4 sm:$0xff]   ;;  %v3258_v30 = vld [vmem:[#allocation5 + $0x6f0] ss:$24 sps:$4 sm:$0xff]  }
  0xba   : > { %2121 = vmatpush1.bf16.msra.mxu0 %v3179_v31  ;;  %2081 = vmatprep.subr.bf16.mxu1 %v3180_v32  ;;  %v3263_v29 = vld [vmem:[#allocation5 + $0xfc] ss:$24 sps:$4 sm:$0xff]   ;;  %v3261_v31 = vld [vmem:[#allocation5 + $0xf8] ss:$24 sps:$4 sm:$0xff]   ;;  %v3317_v5 = vld [vmem:[#allocation5 + $0x2ac] ss:$24 sps:$4 sm:$0xff]  }
  0xbb   : > { %2122 = vmatprep.subr.bf16.mxu0 %v3182_v33  ;;  %v3266_v32 = vld [vmem:[#allocation5 + $0x724] ss:$24 sps:$4 sm:$0xff]   ;;  %v3284_v46 = vld [vmem:[#allocation5 + $0x7b4] ss:$24 sps:$4 sm:$0xff]   ;;  %v3312_v6 = vld [vmem:[#allocation5 + $0x8a0] ss:$24 sps:$4 sm:$0xff]  }
  0xbc   : > { %v3269_v33 = vld [vmem:[#allocation5 + $0x12c] ss:$24 sps:$4 sm:$0xff]   ;;  %v3287_v48 = vld [vmem:[#allocation5 + $0x1bc] ss:$24 sps:$4 sm:$0xff]   ;;  %s2592_s15 = sshll.u32 %s292_s12, 4  ;;  %s2578_s24 = scalar_lea.sflag [#allocation4], %s4032_s22  ;;  %s4147_s15 = int_to_ptr.vmem [resolvable:$true] %s2592_s15 }
  0xbd   : > { %2082 = vmatpush1.bf16.msra.mxu1 %v3184_v34  ;;  %v298_v34 = vld [vmem:[%s4036_s29 + $0x28] sm:$0xff]  ;;  %s3708_s13 = scalar_lea.vmem %s4147_s15, 384  ;;  %s3791_s7 = smov [#allocation11]  }
  0xbe   : > { %2123 = vmatpush1.bf16.msra.mxu0 %v3185_v35  ;;  %2083 = vmatprep.subr.bf16.mxu1 %v3186_v36  ;;  %v4068_v35 = vpack.c.bf16 %v298_v34, %v298_v34  ;;  %v3264_v36 = vld [vmem:[#allocation5 + $0x720] ss:$24 sps:$4 sm:$0xff]   ;;  %p3709_p5 = scmp.ne.s32.totalorder %s4147_s15, %s3708_s13  ;;  %s3712_s10 = sshll.u32 %s3791_s7, 4  ;;  %s3713_s10 = int_to_ptr.vmem [resolvable:$false] %s3712_s10 }
  0xbf   : > { %2124 = vmatprep.subr.bf16.mxu0 %v3188_v37  ;;  %v3267_v37 = vld [vmem:[#allocation5 + $0x128] ss:$24 sps:$4 sm:$0xff]   ;;  %s3714_s14 = scalar_lea.vmem %s3713_s10, 768  ;;  %p3715_p12 = scmp.lt.s32.totalorder %s4147_s15, %s3713_s10 }
  0xc0   : > { %v3348_v34 = vld [vmem:[#allocation5 + $0x3c8] ss:$24 sps:$4 sm:$0xff]   ;;  %p3710_p7 = pnand %p3709_p5, %p4211_p6  ;;  %p3716_p3 = scmp.lt.s32.totalorder %s3714_s14, %s3708_s13 }
  0xc1   : > { %2084 = vmatpush1.bf16.msra.mxu1 %v3190_v38  ;;  %v3272_v38 = vld [vmem:[#allocation5 + $0x754] ss:$24 sps:$4 sm:$0xff]  }
  0xc2   : > { %2125 = vmatpush1.bf16.msra.mxu0 %v3191_v39  ;;  %2085 = vmatprep.subr.bf16.mxu1 %v3192_v40  ;;  %v3275_v39 = vld [vmem:[#allocation5 + $0x15c] ss:$24 sps:$4 sm:$0xff]   ;;  %v3270_v40 = vld [vmem:[#allocation5 + $0x750] ss:$24 sps:$4 sm:$0xff]   ;;  %p3711_p9 = pneg %p3710_p7  ;;  %p3717_p13 = por %p3716_p3, %p3715_p12 }
  0xc3   : > { %2126 = vmatprep.subr.bf16.mxu0 %v3194_v41  ;;  %v3273_v41 = vld [vmem:[#allocation5 + $0x158] ss:$24 sps:$4 sm:$0xff]  }
  0xc4   : > { %p3718_p0 = pnand %p3717_p13, %p3711_p9 }
  0xc5   : > { %2086 = vmatpush1.bf16.msra.mxu1 %v3196_v42  ;;  %v3278_v42 = vld [vmem:[#allocation5 + $0x784] ss:$24 sps:$4 sm:$0xff]  }
  0xc6   : > { %2127 = vmatpush1.bf16.msra.mxu0 %v3197_v43  ;;  %2087 = vmatprep.subr.bf16.mxu1 %v3198_v44  ;;  %v3281_v43 = vld [vmem:[#allocation5 + $0x18c] ss:$24 sps:$4 sm:$0xff]   ;;  %v3276_v44 = vld [vmem:[#allocation5 + $0x780] ss:$24 sps:$4 sm:$0xff]  }
  0xc7   : > { %2128 = vmatprep.subr.bf16.mxu0 %v3200_v45  ;;  %v3279_v45 = vld [vmem:[#allocation5 + $0x188] ss:$24 sps:$4 sm:$0xff]  }
  0xc9   : > { %2088 = vmatpush1.bf16.msra.mxu1 %v3202_v49  ;;  %v3282_v49 = vld [vmem:[#allocation5 + $0x7b0] ss:$24 sps:$4 sm:$0xff]  }
  0xca   : > { %2129 = vmatpush1.bf16.msra.mxu0 %v3203_v50  ;;  %2089 = vmatprep.subr.bf16.mxu1 %v3204_v52  ;;  %v3285_v50 = vld [vmem:[#allocation5 + $0x1b8] ss:$24 sps:$4 sm:$0xff]   ;;  %v3290_v52 = vld [vmem:[#allocation5 + $0x7e4] ss:$24 sps:$4 sm:$0xff]  }
  0xcb   : > { %2130 = vmatprep.subr.bf16.mxu0 %v3206_v53  ;;  %v3293_v53 = vld [vmem:[#allocation5 + $0x1ec] ss:$24 sps:$4 sm:$0xff]  }
  0xcd   : > { %2090 = vmatpush1.bf16.msra.mxu1 %v3208_v54  ;;  %v3288_v54 = vld [vmem:[#allocation5 + $0x7e0] ss:$24 sps:$4 sm:$0xff]  }
  0xce   : > { %2131 = vmatpush1.bf16.msra.mxu0 %v3209_v55  ;;  %2091 = vmatprep.subr.bf16.mxu1 %v3210_v56  ;;  %v3291_v55 = vld [vmem:[#allocation5 + $0x1e8] ss:$24 sps:$4 sm:$0xff]   ;;  %v3296_v56 = vld [vmem:[#allocation5 + $0x814] ss:$24 sps:$4 sm:$0xff]  }
  0xcf   : > { %2132 = vmatprep.subr.bf16.mxu0 %v3212_v57  ;;  %v3299_v57 = vld [vmem:[#allocation5 + $0x21c] ss:$24 sps:$4 sm:$0xff]  }
  0xd1   : > { %2092 = vmatpush1.bf16.msra.mxu1 %v3214_v58  ;;  %v3294_v58 = vld [vmem:[#allocation5 + $0x810] ss:$24 sps:$4 sm:$0xff]  }
  0xd2   : > { %2133 = vmatpush1.bf16.msra.mxu0 %v3215_v59  ;;  %2093 = vmatprep.subr.bf16.mxu1 %v3216_v60  ;;  %v3297_v59 = vld [vmem:[#allocation5 + $0x218] ss:$24 sps:$4 sm:$0xff]   ;;  %v3302_v60 = vld [vmem:[#allocation5 + $0x844] ss:$24 sps:$4 sm:$0xff]  }
  0xd3   : > { %2134 = vmatprep.subr.bf16.mxu0 %v3218_v61  ;;  %v3305_v61 = vld [vmem:[#allocation5 + $0x24c] ss:$24 sps:$4 sm:$0xff]  }
  0xd5   : > { %2094 = vmatpush1.bf16.msra.mxu1 %v3220_v62  ;;  %v3300_v62 = vld [vmem:[#allocation5 + $0x840] ss:$24 sps:$4 sm:$0xff]  }
  0xd6   : > { %2135 = vmatpush1.bf16.msra.mxu0 %v3221_v63  ;;  %2095 = vmatprep.subr.bf16.mxu1 %v3222_v0  ;;  %v3303_v63 = vld [vmem:[#allocation5 + $0x248] ss:$24 sps:$4 sm:$0xff]   ;;  %v3308_v0 = vld [vmem:[#allocation5 + $0x874] ss:$24 sps:$4 sm:$0xff]  }
  0xd7   : > { %2136 = vmatprep.subr.bf16.mxu0 %v3224_v1  ;;  %v3311_v1 = vld [vmem:[#allocation5 + $0x27c] ss:$24 sps:$4 sm:$0xff]  }
  0xd9   : > { %2096 = vmatpush1.bf16.msra.mxu1 %v3226_v2  ;;  %v3306_v2 = vld [vmem:[#allocation5 + $0x870] ss:$24 sps:$4 sm:$0xff]  }
  0xda   : > { %2137 = vmatpush1.bf16.msra.mxu0 %v3227_v3  ;;  %2188 = vmatprep.subr.bf16.mxu1 %v3233_v7  ;;  %v3309_v3 = vld [vmem:[#allocation5 + $0x278] ss:$24 sps:$4 sm:$0xff]   ;;  %v3315_v7 = vld [vmem:[#allocation5 + $0x2a8] ss:$24 sps:$4 sm:$0xff]  }
  0xdb   : > { %2147 = vmatprep.subr.bf16.mxu0 %v3230_v4  ;;  %v3314_v4 = vld [vmem:[#allocation5 + $0x8a4] ss:$24 sps:$4 sm:$0xff]  }
  0xdc   : > { %2098 = vmatmul.mubr.bf16.vlgmr.msra.gmra.mrb[0].mxu1 %v4060_v10 }
  0xdd   : > { %2139 = vmatmul.mubr.bf16.vlgmr.msra.gmra.mrb[0].mxu0 %v4062_v11  ;;  %2189 = vmatpush1.bf16.msra.mxu1 %v3231_v9  ;;  %v3323_v9 = vld [vmem:[#allocation5 + $0x2dc] ss:$24 sps:$4 sm:$0xff]  }
  0xde   : > { %2148 = vmatpush1.bf16.msra.mxu0 %v3228_v8  ;;  %2190 = vmatprep.subr.bf16.mxu1 %v3239_v13  ;;  %v3320_v8 = vld [vmem:[#allocation5 + $0x8d4] ss:$24 sps:$4 sm:$0xff]   ;;  %v3321_v13 = vld [vmem:[#allocation5 + $0x2d8] ss:$24 sps:$4 sm:$0xff]  }
  0xdf   : > { %2149 = vmatprep.subr.bf16.mxu0 %v3236_v12  ;;  %2220 = vmatprep.mubr.bf16.mxu1 %v4051_v47  ;;  %v3318_v12 = vld [vmem:[#allocation5 + $0x8d0] ss:$24 sps:$4 sm:$0xff]  }
  0xe0   : > { %2179 = vmatprep.mubr.bf16.mxu0 %v4068_v35 }
  0xe1   : > { %2191 = vmatpush1.bf16.msra.mxu1 %v3237_v15  ;;  %v3326_v15 = vld [vmem:[#allocation5 + $0x30c] ss:$24 sps:$4 sm:$0xff]  }
  0xe2   : > { %2150 = vmatpush1.bf16.msra.mxu0 %v3234_v14  ;;  %2192 = vmatprep.subr.bf16.mxu1 %v3245_v17  ;;  %v297_v14 = vld [vmem:[%s4036_s29 + $0x20] sm:$0xff] }
  0xe3   : > { %2151 = vmatprep.subr.bf16.mxu0 %v3242_v16  ;;  %v3329_v16 = vld [vmem:[#allocation5 + $0x14] ss:$24 sps:$4 sm:$0xff]   ;;  %v4072_v17 = vpack.c.bf16 %v297_v14, %v297_v14  ;;  %v3408_v14 = vld [vmem:[#allocation5 + $0x5a8] ss:$24 sps:$4 sm:$0xff]  }
  0xe5   : > { %2193 = vmatpush1.bf16.msra.mxu1 %v3243_v19  ;;  %v3327_v19 = vld [vmem:[#allocation5 + $0x10] ss:$24 sps:$4 sm:$0xff]  }
  0xe6   : > { %2152 = vmatpush1.bf16.msra.mxu0 %v3240_v18  ;;  %2194 = vmatprep.subr.bf16.mxu1 %v3251_v21  ;;  %v3324_v18 = vld [vmem:[#allocation5 + $0x308] ss:$24 sps:$4 sm:$0xff]   ;;  %v3335_v21 = vld [vmem:[#allocation5 + $0x44] ss:$24 sps:$4 sm:$0xff]  }
  0xe7   : > { %2153 = vmatprep.subr.bf16.mxu0 %v3248_v20  ;;  %v3332_v20 = vld [vmem:[#allocation5 + $0x33c] ss:$24 sps:$4 sm:$0xff]  }
  0xe9   : > { %2195 = vmatpush1.bf16.msra.mxu1 %v3249_v23  ;;  %v3333_v23 = vld [vmem:[#allocation5 + $0x40] ss:$24 sps:$4 sm:$0xff]  }
  0xea   : > { %2154 = vmatpush1.bf16.msra.mxu0 %v3246_v22  ;;  %2196 = vmatprep.subr.bf16.mxu1 %v3257_v25  ;;  %v3330_v22 = vld [vmem:[#allocation5 + $0x338] ss:$24 sps:$4 sm:$0xff]   ;;  %v3341_v25 = vld [vmem:[#allocation5 + $0x74] ss:$24 sps:$4 sm:$0xff]  }
  0xeb   : > { %2155 = vmatprep.subr.bf16.mxu0 %v3254_v24  ;;  %v3338_v24 = vld [vmem:[#allocation5 + $0x36c] ss:$24 sps:$4 sm:$0xff]  }
  0xed   : > { %2197 = vmatpush1.bf16.msra.mxu1 %v3255_v27  ;;  %v3339_v27 = vld [vmem:[#allocation5 + $0x70] ss:$24 sps:$4 sm:$0xff]  }
  0xee   : > { %2156 = vmatpush1.bf16.msra.mxu0 %v3252_v26  ;;  %2198 = vmatprep.subr.bf16.mxu1 %v3263_v29  ;;  %v3336_v26 = vld [vmem:[#allocation5 + $0x368] ss:$24 sps:$4 sm:$0xff]   ;;  %v3347_v29 = vld [vmem:[#allocation5 + $0xa4] ss:$24 sps:$4 sm:$0xff]  }
  0xef   : > { %2157 = vmatprep.subr.bf16.mxu0 %v3260_v28  ;;  %v3344_v28 = vld [vmem:[#allocation5 + $0x39c] ss:$24 sps:$4 sm:$0xff]  }
  0xf1   : > { %2199 = vmatpush1.bf16.msra.mxu1 %v3261_v31  ;;  %v3345_v31 = vld [vmem:[#allocation5 + $0xa0] ss:$24 sps:$4 sm:$0xff]  }
  0xf2   : > { %2158 = vmatpush1.bf16.msra.mxu0 %v3258_v30  ;;  %2200 = vmatprep.subr.bf16.mxu1 %v3269_v33  ;;  %v3342_v30 = vld [vmem:[#allocation5 + $0x398] ss:$24 sps:$4 sm:$0xff]   ;;  %v3353_v33 = vld [vmem:[#allocation5 + $0xd4] ss:$24 sps:$4 sm:$0xff]  }
  0xf3   : > { %2159 = vmatprep.subr.bf16.mxu0 %v3266_v32  ;;  %v3350_v32 = vld [vmem:[#allocation5 + $0x3cc] ss:$24 sps:$4 sm:$0xff]  }
  0xf5   : > { %2201 = vmatpush1.bf16.msra.mxu1 %v3267_v37  ;;  %v3359_v37 = vld [vmem:[#allocation5 + $0x104] ss:$24 sps:$4 sm:$0xff]  }
  0xf6   : > { %2160 = vmatpush1.bf16.msra.mxu0 %v3264_v36  ;;  %2202 = vmatprep.subr.bf16.mxu1 %v3275_v39  ;;  %v3356_v36 = vld [vmem:[#allocation5 + $0x3fc] ss:$24 sps:$4 sm:$0xff]   ;;  %v3357_v39 = vld [vmem:[#allocation5 + $0x100] ss:$24 sps:$4 sm:$0xff]  }
  0xf7   : > { %2161 = vmatprep.subr.bf16.mxu0 %v3272_v38  ;;  %v3354_v38 = vld [vmem:[#allocation5 + $0x3f8] ss:$24 sps:$4 sm:$0xff]  }
  0xf9   : > { %2203 = vmatpush1.bf16.msra.mxu1 %v3273_v41  ;;  %v3365_v41 = vld [vmem:[#allocation5 + $0x134] ss:$24 sps:$4 sm:$0xff]  }
  0xfa   : > { %2162 = vmatpush1.bf16.msra.mxu0 %v3270_v40  ;;  %2204 = vmatprep.subr.bf16.mxu1 %v3281_v43  ;;  %v3362_v40 = vld [vmem:[#allocation5 + $0x42c] ss:$24 sps:$4 sm:$0xff]   ;;  %v3363_v43 = vld [vmem:[#allocation5 + $0x130] ss:$24 sps:$4 sm:$0xff]  }
  0xfb   : > { %2163 = vmatprep.subr.bf16.mxu0 %v3278_v42  ;;  %v3360_v42 = vld [vmem:[#allocation5 + $0x428] ss:$24 sps:$4 sm:$0xff]  }
  0xfd   : > { %2205 = vmatpush1.bf16.msra.mxu1 %v3279_v45  ;;  %v3371_v45 = vld [vmem:[#allocation5 + $0x164] ss:$24 sps:$4 sm:$0xff]  }
  0xfe   : > { %2164 = vmatpush1.bf16.msra.mxu0 %v3276_v44  ;;  %2206 = vmatprep.subr.bf16.mxu1 %v3287_v48  ;;  %v3368_v44 = vld [vmem:[#allocation5 + $0x45c] ss:$24 sps:$4 sm:$0xff]   ;;  %v3369_v48 = vld [vmem:[#allocation5 + $0x160] ss:$24 sps:$4 sm:$0xff]  }
  0xff   : > { %2165 = vmatprep.subr.bf16.mxu0 %v3284_v46  ;;  %v3366_v46 = vld [vmem:[#allocation5 + $0x458] ss:$24 sps:$4 sm:$0xff]  }
 0x101   : > { %2207 = vmatpush1.bf16.msra.mxu1 %v3285_v50  ;;  %v3377_v50 = vld [vmem:[#allocation5 + $0x194] ss:$24 sps:$4 sm:$0xff]  }
 0x102   : > { %2166 = vmatpush1.bf16.msra.mxu0 %v3282_v49  ;;  %2208 = vmatprep.subr.bf16.mxu1 %v3293_v53  ;;  %v3374_v49 = vld [vmem:[#allocation5 + $0x48c] ss:$24 sps:$4 sm:$0xff]   ;;  %v3375_v53 = vld [vmem:[#allocation5 + $0x190] ss:$24 sps:$4 sm:$0xff]  }
 0x103   : > { %2167 = vmatprep.subr.bf16.mxu0 %v3290_v52  ;;  %v3372_v52 = vld [vmem:[#allocation5 + $0x488] ss:$24 sps:$4 sm:$0xff]  }
 0x105   : > { %2209 = vmatpush1.bf16.msra.mxu1 %v3291_v55  ;;  %v3383_v55 = vld [vmem:[#allocation5 + $0x1c4] ss:$24 sps:$4 sm:$0xff]  }
 0x106   : > { %2168 = vmatpush1.bf16.msra.mxu0 %v3288_v54  ;;  %2210 = vmatprep.subr.bf16.mxu1 %v3299_v57  ;;  %v3380_v54 = vld [vmem:[#allocation5 + $0x4bc] ss:$24 sps:$4 sm:$0xff]   ;;  %v3381_v57 = vld [vmem:[#allocation5 + $0x1c0] ss:$24 sps:$4 sm:$0xff]  }
 0x107   : > { %2169 = vmatprep.subr.bf16.mxu0 %v3296_v56  ;;  %v3378_v56 = vld [vmem:[#allocation5 + $0x4b8] ss:$24 sps:$4 sm:$0xff]  }
 0x109   : > { %2211 = vmatpush1.bf16.msra.mxu1 %v3297_v59  ;;  %v3389_v59 = vld [vmem:[#allocation5 + $0x1f4] ss:$24 sps:$4 sm:$0xff]  }
 0x10a   : > { %2170 = vmatpush1.bf16.msra.mxu0 %v3294_v58  ;;  %2212 = vmatprep.subr.bf16.mxu1 %v3305_v61  ;;  %v3386_v58 = vld [vmem:[#allocation5 + $0x4ec] ss:$24 sps:$4 sm:$0xff]   ;;  %v3387_v61 = vld [vmem:[#allocation5 + $0x1f0] ss:$24 sps:$4 sm:$0xff]  }
 0x10b   : > { %2171 = vmatprep.subr.bf16.mxu0 %v3302_v60  ;;  %v3384_v60 = vld [vmem:[#allocation5 + $0x4e8] ss:$24 sps:$4 sm:$0xff]  }
 0x10d   : > { %2213 = vmatpush1.bf16.msra.mxu1 %v3303_v63  ;;  %v3395_v63 = vld [vmem:[#allocation5 + $0x224] ss:$24 sps:$4 sm:$0xff]  }
 0x10e   : > { %2172 = vmatpush1.bf16.msra.mxu0 %v3300_v62  ;;  %2214 = vmatprep.subr.bf16.mxu1 %v3311_v1  ;;  %v3392_v62 = vld [vmem:[#allocation5 + $0x51c] ss:$24 sps:$4 sm:$0xff]   ;;  %v3393_v1 = vld [vmem:[#allocation5 + $0x220] ss:$24 sps:$4 sm:$0xff]  }
 0x10f   : > { %2173 = vmatprep.subr.bf16.mxu0 %v3308_v0  ;;  %v3390_v0 = vld [vmem:[#allocation5 + $0x518] ss:$24 sps:$4 sm:$0xff]  }
 0x111   : > { %2215 = vmatpush1.bf16.msra.mxu1 %v3309_v3  ;;  %v3401_v3 = vld [vmem:[#allocation5 + $0x254] ss:$24 sps:$4 sm:$0xff]  }
 0x112   : > { %2174 = vmatpush1.bf16.msra.mxu0 %v3306_v2  ;;  %2216 = vmatprep.subr.bf16.mxu1 %v3317_v5  ;;  %v3398_v2 = vld [vmem:[#allocation5 + $0x54c] ss:$24 sps:$4 sm:$0xff]   ;;  %v3399_v5 = vld [vmem:[#allocation5 + $0x250] ss:$24 sps:$4 sm:$0xff]  }
 0x113   : > { %2175 = vmatprep.subr.bf16.mxu0 %v3314_v4  ;;  %v3396_v4 = vld [vmem:[#allocation5 + $0x548] ss:$24 sps:$4 sm:$0xff]  }
 0x115   : > { %2217 = vmatpush1.bf16.msra.mxu1 %v3315_v7  ;;  %v3407_v7 = vld [vmem:[#allocation5 + $0x284] ss:$24 sps:$4 sm:$0xff]  }
 0x116   : > { %2176 = vmatpush1.bf16.msra.mxu0 %v3312_v6  ;;  %2218 = vmatprep.subr.bf16.mxu1 %v3323_v9  ;;  %v3404_v6 = vld [vmem:[#allocation5 + $0x57c] ss:$24 sps:$4 sm:$0xff]   ;;  %v3405_v9 = vld [vmem:[#allocation5 + $0x280] ss:$24 sps:$4 sm:$0xff]  }
 0x117   : > { %2177 = vmatprep.subr.bf16.mxu0 %v3320_v8  ;;  %v3402_v8 = vld [vmem:[#allocation5 + $0x578] ss:$24 sps:$4 sm:$0xff]  }
 0x119   : > { %2219 = vmatpush1.bf16.msra.mxu1 %v3321_v13  ;;  %v3413_v13 = vld [vmem:[#allocation5 + $0x2b4] ss:$24 sps:$4 sm:$0xff]  }
 0x11a   : > { %2178 = vmatpush1.bf16.msra.mxu0 %v3318_v12  ;;  %2229 = vmatprep.subr.bf16.mxu1 %v3326_v15  ;;  %v3410_v12 = vld [vmem:[#allocation5 + $0x5ac] ss:$24 sps:$4 sm:$0xff]   ;;  %v3411_v15 = vld [vmem:[#allocation5 + $0x2b0] ss:$24 sps:$4 sm:$0xff]  }
 0x11b   : > { %2311 = vmatprep.subr.bf16.mxu0 %v3329_v16  ;;  %v3416_v16 = vld [vmem:[#allocation5 + $0x5dc] ss:$24 sps:$4 sm:$0xff]  }
 0x11c   : > { %2221 = vmatmul.mubr.bf16.vlgmr.msra.gmra.mrb[4].mxu1 %v4060_v10 }
 0x11d   : > { %2180 = vmatmul.mubr.bf16.vlgmr.msra.gmra.mrb[0].mxu0 %v4072_v17  ;;  %2230 = vmatpush1.bf16.msra.mxu1 %v3324_v18  ;;  %v3419_v18 = vld [vmem:[#allocation5 + $0x2e4] ss:$24 sps:$4 sm:$0xff]  }
 0x11e   : > { %2312 = vmatpush1.bf16.msra.mxu0 %v3327_v19  ;;  %2231 = vmatprep.subr.bf16.mxu1 %v3332_v20  ;;  %v3414_v19 = vld [vmem:[#allocation5 + $0x5d8] ss:$24 sps:$4 sm:$0xff]  }
 0x11f   : > { %2313 = vmatprep.subr.bf16.mxu0 %v3335_v21  ;;  %2261 = vmatprep.mubr.bf16.mxu1 %v4054_v51  ;;  %v3417_v20 = vld [vmem:[#allocation5 + $0x2e0] ss:$24 sps:$4 sm:$0xff]   ;;  %v3422_v21 = vld [vmem:[#allocation5 + $0x60c] ss:$24 sps:$4 sm:$0xff]  }
 0x120   : > { %2343 = vmatprep.mubr.bf16.mxu0 %v4051_v47  ;;  %v3351_v47 = vld [vmem:[#allocation5 + $0xd0] ss:$24 sps:$4 sm:$0xff]  }
 0x121   : > { %2232 = vmatpush1.bf16.msra.mxu1 %v3330_v22  ;;  %v3425_v22 = vld [vmem:[#allocation5 + $0x314] ss:$24 sps:$4 sm:$0xff]  }
 0x122   : > { %2314 = vmatpush1.bf16.msra.mxu0 %v3333_v23  ;;  %2233 = vmatprep.subr.bf16.mxu1 %v3338_v24  ;;  %v3420_v23 = vld [vmem:[#allocation5 + $0x608] ss:$24 sps:$4 sm:$0xff]  }
 0x123   : > { %2315 = vmatprep.subr.bf16.mxu0 %v3341_v25  ;;  %v3423_v24 = vld [vmem:[#allocation5 + $0x310] ss:$24 sps:$4 sm:$0xff]   ;;  %v3428_v25 = vld [vmem:[#allocation5 + $0x63c] ss:$24 sps:$4 sm:$0xff]  }
 0x125   : > { %2234 = vmatpush1.bf16.msra.mxu1 %v3336_v26  ;;  %v3431_v26 = vld [vmem:[#allocation5 + $0x344] ss:$24 sps:$4 sm:$0xff]  }
 0x126   : > { %2316 = vmatpush1.bf16.msra.mxu0 %v3339_v27  ;;  %2235 = vmatprep.subr.bf16.mxu1 %v3344_v28  ;;  %v3426_v27 = vld [vmem:[#allocation5 + $0x638] ss:$24 sps:$4 sm:$0xff]  }
 0x127   : > { %2317 = vmatprep.subr.bf16.mxu0 %v3347_v29  ;;  %v3429_v28 = vld [vmem:[#allocation5 + $0x340] ss:$24 sps:$4 sm:$0xff]   ;;  %v3434_v29 = vld [vmem:[#allocation5 + $0x66c] ss:$24 sps:$4 sm:$0xff]  }
 0x129   : > { %2236 = vmatpush1.bf16.msra.mxu1 %v3342_v30  ;;  %v3437_v30 = vld [vmem:[#allocation5 + $0x374] ss:$24 sps:$4 sm:$0xff]  }
 0x12a   : > { %2318 = vmatpush1.bf16.msra.mxu0 %v3345_v31  ;;  %2237 = vmatprep.subr.bf16.mxu1 %v3350_v32  ;;  %v3432_v31 = vld [vmem:[#allocation5 + $0x668] ss:$24 sps:$4 sm:$0xff]  }
 0x12b   : > { %2319 = vmatprep.subr.bf16.mxu0 %v3353_v33  ;;  %v3435_v32 = vld [vmem:[#allocation5 + $0x370] ss:$24 sps:$4 sm:$0xff]   ;;  %v3440_v33 = vld [vmem:[#allocation5 + $0x69c] ss:$24 sps:$4 sm:$0xff]  }
 0x12d   : > { %2238 = vmatpush1.bf16.msra.mxu1 %v3348_v34  ;;  %v3438_v34 = vld [vmem:[#allocation5 + $0x698] ss:$24 sps:$4 sm:$0xff]  }
 0x12e   : > { %2320 = vmatpush1.bf16.msra.mxu0 %v3351_v47  ;;  %2239 = vmatprep.subr.bf16.mxu1 %v3356_v36  ;;  %v3441_v47 = vld [vmem:[#allocation5 + $0x3a0] ss:$24 sps:$4 sm:$0xff]   ;;  %v3446_v36 = vld [vmem:[#allocation5 + $0x6cc] ss:$24 sps:$4 sm:$0xff]  }
 0x12f   : > { %2321 = vmatprep.subr.bf16.mxu0 %v3359_v37  ;;  %v3449_v37 = vld [vmem:[#allocation5 + $0x3d4] ss:$24 sps:$4 sm:$0xff]  }
 0x131   : > { %2240 = vmatpush1.bf16.msra.mxu1 %v3354_v38  ;;  %v3444_v38 = vld [vmem:[#allocation5 + $0x6c8] ss:$24 sps:$4 sm:$0xff]  }
 0x132   : > { %2322 = vmatpush1.bf16.msra.mxu0 %v3357_v39  ;;  %2241 = vmatprep.subr.bf16.mxu1 %v3362_v40  ;;  %v3452_v39 = vld [vmem:[#allocation5 + $0x6fc] ss:$24 sps:$4 sm:$0xff]  }
 0x133   : > { %2323 = vmatprep.subr.bf16.mxu0 %v3365_v41  ;;  %v3455_v40 = vld [vmem:[#allocation5 + $0x404] ss:$24 sps:$4 sm:$0xff]   ;;  %v3450_v41 = vld [vmem:[#allocation5 + $0x6f8] ss:$24 sps:$4 sm:$0xff]  }
 0x135   : > { %2242 = vmatpush1.bf16.msra.mxu1 %v3360_v42  ;;  %v3453_v42 = vld [vmem:[#allocation5 + $0x400] ss:$24 sps:$4 sm:$0xff]  }
 0x136   : > { %2324 = vmatpush1.bf16.msra.mxu0 %v3363_v43  ;;  %2243 = vmatprep.subr.bf16.mxu1 %v3368_v44  ;;  %v3458_v43 = vld [vmem:[#allocation5 + $0x72c] ss:$24 sps:$4 sm:$0xff]  }
 0x137   : > { %2325 = vmatprep.subr.bf16.mxu0 %v3371_v45  ;;  %v3461_v44 = vld [vmem:[#allocation5 + $0x434] ss:$24 sps:$4 sm:$0xff]   ;;  %v3456_v45 = vld [vmem:[#allocation5 + $0x728] ss:$24 sps:$4 sm:$0xff]  }
 0x139   : > { %2244 = vmatpush1.bf16.msra.mxu1 %v3366_v46  ;;  %v3459_v46 = vld [vmem:[#allocation5 + $0x430] ss:$24 sps:$4 sm:$0xff]  }
 0x13a   : > { %2326 = vmatpush1.bf16.msra.mxu0 %v3369_v48  ;;  %2245 = vmatprep.subr.bf16.mxu1 %v3374_v49  ;;  %v3464_v48 = vld [vmem:[#allocation5 + $0x75c] ss:$24 sps:$4 sm:$0xff]  }
 0x13b   : > { %2327 = vmatprep.subr.bf16.mxu0 %v3377_v50  ;;  %v3467_v49 = vld [vmem:[#allocation5 + $0x464] ss:$24 sps:$4 sm:$0xff]   ;;  %v3462_v50 = vld [vmem:[#allocation5 + $0x758] ss:$24 sps:$4 sm:$0xff]  }
 0x13d   : > { %2246 = vmatpush1.bf16.msra.mxu1 %v3372_v52  ;;  %v3465_v52 = vld [vmem:[#allocation5 + $0x460] ss:$24 sps:$4 sm:$0xff]  }
 0x13e   : > { %2328 = vmatpush1.bf16.msra.mxu0 %v3375_v53  ;;  %2247 = vmatprep.subr.bf16.mxu1 %v3380_v54  ;;  %v3470_v53 = vld [vmem:[#allocation5 + $0x78c] ss:$24 sps:$4 sm:$0xff]  }
 0x13f   : > { %2329 = vmatprep.subr.bf16.mxu0 %v3383_v55  ;;  %v3473_v54 = vld [vmem:[#allocation5 + $0x494] ss:$24 sps:$4 sm:$0xff]   ;;  %v3468_v55 = vld [vmem:[#allocation5 + $0x788] ss:$24 sps:$4 sm:$0xff]  }
 0x141   : > { %2248 = vmatpush1.bf16.msra.mxu1 %v3378_v56  ;;  %v3471_v56 = vld [vmem:[#allocation5 + $0x490] ss:$24 sps:$4 sm:$0xff]  }
 0x142   : > { %2330 = vmatpush1.bf16.msra.mxu0 %v3381_v57  ;;  %2249 = vmatprep.subr.bf16.mxu1 %v3386_v58  ;;  %v3476_v57 = vld [vmem:[#allocation5 + $0x7bc] ss:$24 sps:$4 sm:$0xff]  }
 0x143   : > { %2331 = vmatprep.subr.bf16.mxu0 %v3389_v59  ;;  %v3479_v58 = vld [vmem:[#allocation5 + $0x4c4] ss:$24 sps:$4 sm:$0xff]   ;;  %v3474_v59 = vld [vmem:[#allocation5 + $0x7b8] ss:$24 sps:$4 sm:$0xff]  }
 0x145   : > { %2250 = vmatpush1.bf16.msra.mxu1 %v3384_v60  ;;  %v3477_v60 = vld [vmem:[#allocation5 + $0x4c0] ss:$24 sps:$4 sm:$0xff]  }
 0x146   : > { %2332 = vmatpush1.bf16.msra.mxu0 %v3387_v61  ;;  %2251 = vmatprep.subr.bf16.mxu1 %v3392_v62  ;;  %v3482_v61 = vld [vmem:[#allocation5 + $0x7ec] ss:$24 sps:$4 sm:$0xff]  }
 0x147   : > { %2333 = vmatprep.subr.bf16.mxu0 %v3395_v63  ;;  %v3485_v62 = vld [vmem:[#allocation5 + $0x4f4] ss:$24 sps:$4 sm:$0xff]   ;;  %v3480_v63 = vld [vmem:[#allocation5 + $0x7e8] ss:$24 sps:$4 sm:$0xff]  }
 0x149   : > { %2252 = vmatpush1.bf16.msra.mxu1 %v3390_v0  ;;  %v3483_v0 = vld [vmem:[#allocation5 + $0x4f0] ss:$24 sps:$4 sm:$0xff]  }
 0x14a   : > { %2334 = vmatpush1.bf16.msra.mxu0 %v3393_v1  ;;  %2253 = vmatprep.subr.bf16.mxu1 %v3398_v2  ;;  %v3488_v1 = vld [vmem:[#allocation5 + $0x81c] ss:$24 sps:$4 sm:$0xff]  }
 0x14b   : > { %2335 = vmatprep.subr.bf16.mxu0 %v3401_v3  ;;  %v3491_v2 = vld [vmem:[#allocation5 + $0x524] ss:$24 sps:$4 sm:$0xff]   ;;  %v3486_v3 = vld [vmem:[#allocation5 + $0x818] ss:$24 sps:$4 sm:$0xff]  }
 0x14d   : > { %2254 = vmatpush1.bf16.msra.mxu1 %v3396_v4  ;;  %v3489_v4 = vld [vmem:[#allocation5 + $0x520] ss:$24 sps:$4 sm:$0xff]  }
 0x14e   : > { %2336 = vmatpush1.bf16.msra.mxu0 %v3399_v5  ;;  %2255 = vmatprep.subr.bf16.mxu1 %v3404_v6  ;;  %v3494_v5 = vld [vmem:[#allocation5 + $0x84c] ss:$24 sps:$4 sm:$0xff]  }
 0x14f   : > { %2337 = vmatprep.subr.bf16.mxu0 %v3407_v7  ;;  %v3497_v6 = vld [vmem:[#allocation5 + $0x554] ss:$24 sps:$4 sm:$0xff]   ;;  %v3492_v7 = vld [vmem:[#allocation5 + $0x848] ss:$24 sps:$4 sm:$0xff]  }
 0x151   : > { %2256 = vmatpush1.bf16.msra.mxu1 %v3402_v8  ;;  %v3495_v8 = vld [vmem:[#allocation5 + $0x550] ss:$24 sps:$4 sm:$0xff]  }
 0x152   : > { %2338 = vmatpush1.bf16.msra.mxu0 %v3405_v9  ;;  %2257 = vmatprep.subr.bf16.mxu1 %v3410_v12  ;;  %v3500_v9 = vld [vmem:[#allocation5 + $0x87c] ss:$24 sps:$4 sm:$0xff]  }
 0x153   : > { %2339 = vmatprep.subr.bf16.mxu0 %v3413_v13  ;;  %v3503_v12 = vld [vmem:[#allocation5 + $0x584] ss:$24 sps:$4 sm:$0xff]   ;;  %v3498_v13 = vld [vmem:[#allocation5 + $0x878] ss:$24 sps:$4 sm:$0xff]  }
 0x155   : > { %2258 = vmatpush1.bf16.msra.mxu1 %v3408_v14  ;;  %v3501_v14 = vld [vmem:[#allocation5 + $0x580] ss:$24 sps:$4 sm:$0xff]  }
 0x156   : > { %2340 = vmatpush1.bf16.msra.mxu0 %v3411_v15  ;;  %2259 = vmatprep.subr.bf16.mxu1 %v3416_v16  ;;  %v3506_v15 = vld [vmem:[#allocation5 + $0x8ac] ss:$24 sps:$4 sm:$0xff]  }
 0x157   : > { %2341 = vmatprep.subr.bf16.mxu0 %v3419_v18  ;;  %v3509_v16 = vld [vmem:[#allocation5 + $0x5b4] ss:$24 sps:$4 sm:$0xff]   ;;  %v3504_v18 = vld [vmem:[#allocation5 + $0x8a8] ss:$24 sps:$4 sm:$0xff]  }
 0x159   : > { %2260 = vmatpush1.bf16.msra.mxu1 %v3414_v19  ;;  %v3507_v19 = vld [vmem:[#allocation5 + $0x5b0] ss:$24 sps:$4 sm:$0xff]  }
 0x15a   : > { %2342 = vmatpush1.bf16.msra.mxu0 %v3417_v20  ;;  %2270 = vmatprep.subr.bf16.mxu1 %v3422_v21  ;;  %v3512_v20 = vld [vmem:[#allocation5 + $0x8dc] ss:$24 sps:$4 sm:$0xff]  }
 0x15b   : > { %2352 = vmatprep.subr.bf16.mxu0 %v3425_v22  ;;  %v3515_v21 = vld [vmem:[#allocation5 + $0x5e4] ss:$24 sps:$4 sm:$0xff]   ;;  %v3510_v22 = vld [vmem:[#allocation5 + $0x8d8] ss:$24 sps:$4 sm:$0xff]  }
 0x15c   : > { %2262 = vmatmul.mubr.bf16.vlgmr.msra.gmra.mrb[4].mxu1 %v4062_v11 }
 0x15d   : > { %2344 = vmatmul.mubr.bf16.vlgmr.msra.gmra.mrb[4].mxu0 %v4060_v10  ;;  %2271 = vmatpush1.bf16.msra.mxu1 %v3420_v23  ;;  %v3443_v10 = vld [vmem:[#allocation5 + $0x3a4] ss:$24 sps:$4 sm:$0xff]   ;;  %v3513_v23 = vld [vmem:[#allocation5 + $0x5e0] ss:$24 sps:$4 sm:$0xff]  }
 0x15e   : > { %2353 = vmatpush1.bf16.msra.mxu0 %v3423_v24  ;;  %2272 = vmatprep.subr.bf16.mxu1 %v3428_v25  ;;  %v3518_v24 = vld [vmem:[#allocation5 + $0x614] ss:$24 sps:$4 sm:$0xff]   ;;  %v3516_v25 = vld [vmem:[#allocation5 + $0x610] ss:$24 sps:$4 sm:$0xff]  }
 0x15f   : > { %2354 = vmatprep.subr.bf16.mxu0 %v3431_v26  ;;  %2302 = vmatprep.mubr.bf16.mxu1 %v4068_v35  ;;  %v3521_v26 = vld [vmem:[#allocation5 + $0x644] ss:$24 sps:$4 sm:$0xff]  }
 0x160   : > { %2384 = vmatprep.mubr.bf16.mxu0 %v4054_v51  ;;  %v3447_v51 = vld [vmem:[#allocation5 + $0x3d0] ss:$24 sps:$4 sm:$0xff]  }
 0x161   : > { %2273 = vmatpush1.bf16.msra.mxu1 %v3426_v27  ;;  %v3519_v27 = vld [vmem:[#allocation5 + $0x640] ss:$24 sps:$4 sm:$0xff]  }
 0x162   : > { %2355 = vmatpush1.bf16.msra.mxu0 %v3429_v28  ;;  %2274 = vmatprep.subr.bf16.mxu1 %v3434_v29  ;;  %v3524_v28 = vld [vmem:[#allocation5 + $0x674] ss:$24 sps:$4 sm:$0xff]   ;;  %v3522_v29 = vld [vmem:[#allocation5 + $0x670] ss:$24 sps:$4 sm:$0xff]  }
 0x163   : > { %2356 = vmatprep.subr.bf16.mxu0 %v3437_v30  ;;  %v3527_v30 = vld [vmem:[#allocation5 + $0x6a4] ss:$24 sps:$4 sm:$0xff]  }
 0x165   : > { %2275 = vmatpush1.bf16.msra.mxu1 %v3432_v31  ;;  %v3525_v31 = vld [vmem:[#allocation5 + $0x6a0] ss:$24 sps:$4 sm:$0xff]  }
 0x166   : > { %2357 = vmatpush1.bf16.msra.mxu0 %v3435_v32  ;;  %2276 = vmatprep.subr.bf16.mxu1 %v3440_v33  ;;  %v3530_v32 = vld [vmem:[#allocation5 + $0x6d4] ss:$24 sps:$4 sm:$0xff]   ;;  %v3528_v33 = vld [vmem:[#allocation5 + $0x6d0] ss:$24 sps:$4 sm:$0xff]  }
 0x167   : > { %2358 = vmatprep.subr.bf16.mxu0 %v3443_v10  ;;  %v3533_v10 = vld [vmem:[#allocation5 + $0x704] ss:$24 sps:$4 sm:$0xff]  }
 0x169   : > { %2277 = vmatpush1.bf16.msra.mxu1 %v3438_v34  ;;  %v3536_v34 = vld [vmem:[#allocation5 + $0x734] ss:$24 sps:$4 sm:$0xff]  }
 0x16a   : > { %2359 = vmatpush1.bf16.msra.mxu0 %v3441_v47  ;;  %2278 = vmatprep.subr.bf16.mxu1 %v3446_v36  ;;  %v3534_v36 = vld [vmem:[#allocation5 + $0x730] ss:$24 sps:$4 sm:$0xff]  }
 0x16b   : > { %2360 = vmatprep.subr.bf16.mxu0 %v3449_v37 }
 0x16d   : > { %2279 = vmatpush1.bf16.msra.mxu1 %v3444_v38  ;;  %v3539_v38 = vld [vmem:[#allocation5 + $0x764] ss:$24 sps:$4 sm:$0xff]  }
 0x16e   : > { %2361 = vmatpush1.bf16.msra.mxu0 %v3447_v51  ;;  %2280 = vmatprep.subr.bf16.mxu1 %v3452_v39  ;;  %v3537_v39 = vld [vmem:[#allocation5 + $0x760] ss:$24 sps:$4 sm:$0xff]  }
 0x16f   : > { %2362 = vmatprep.subr.bf16.mxu0 %v3455_v40  ;;  %v3542_v40 = vld [vmem:[#allocation5 + $0x794] ss:$24 sps:$4 sm:$0xff]  }
 0x171   : > { %2281 = vmatpush1.bf16.msra.mxu1 %v3450_v41  ;;  %v3540_v41 = vld [vmem:[#allocation5 + $0x790] ss:$24 sps:$4 sm:$0xff]  }
 0x172   : > { %2363 = vmatpush1.bf16.msra.mxu0 %v3453_v42  ;;  %2282 = vmatprep.subr.bf16.mxu1 %v3458_v43  ;;  %v3545_v42 = vld [vmem:[#allocation5 + $0x7c4] ss:$24 sps:$4 sm:$0xff]   ;;  %v3543_v43 = vld [vmem:[#allocation5 + $0x7c0] ss:$24 sps:$4 sm:$0xff]  }
 0x173   : > { %2364 = vmatprep.subr.bf16.mxu0 %v3461_v44  ;;  %v3548_v44 = vld [vmem:[#allocation5 + $0x7f4] ss:$24 sps:$4 sm:$0xff]  }
 0x175   : > { %2283 = vmatpush1.bf16.msra.mxu1 %v3456_v45  ;;  %v3546_v45 = vld [vmem:[#allocation5 + $0x7f0] ss:$24 sps:$4 sm:$0xff]  }
 0x176   : > { %2365 = vmatpush1.bf16.msra.mxu0 %v3459_v46  ;;  %2284 = vmatprep.subr.bf16.mxu1 %v3464_v48  ;;  %v3551_v46 = vld [vmem:[#allocation5 + $0x824] ss:$24 sps:$4 sm:$0xff]   ;;  %v3549_v48 = vld [vmem:[#allocation5 + $0x820] ss:$24 sps:$4 sm:$0xff]  }
 0x177   : > { %2366 = vmatprep.subr.bf16.mxu0 %v3467_v49  ;;  %v3554_v49 = vld [vmem:[#allocation5 + $0x854] ss:$24 sps:$4 sm:$0xff]  }
 0x179   : > { %2285 = vmatpush1.bf16.msra.mxu1 %v3462_v50  ;;  %v3552_v50 = vld [vmem:[#allocation5 + $0x850] ss:$24 sps:$4 sm:$0xff]  }
 0x17a   : > { %2367 = vmatpush1.bf16.msra.mxu0 %v3465_v52  ;;  %2286 = vmatprep.subr.bf16.mxu1 %v3470_v53  ;;  %v3557_v52 = vld [vmem:[#allocation5 + $0x884] ss:$24 sps:$4 sm:$0xff]   ;;  %v3555_v53 = vld [vmem:[#allocation5 + $0x880] ss:$24 sps:$4 sm:$0xff]  }
 0x17b   : > { %2368 = vmatprep.subr.bf16.mxu0 %v3473_v54  ;;  %v3560_v54 = vld [vmem:[#allocation5 + $0x8b4] ss:$24 sps:$4 sm:$0xff]  }
 0x17d   : > { %2287 = vmatpush1.bf16.msra.mxu1 %v3468_v55  ;;  %v3558_v55 = vld [vmem:[#allocation5 + $0x8b0] ss:$24 sps:$4 sm:$0xff]  }
 0x17e   : > { %2369 = vmatpush1.bf16.msra.mxu0 %v3471_v56  ;;  %2288 = vmatprep.subr.bf16.mxu1 %v3476_v57  ;;  %v3563_v56 = vld [vmem:[#allocation5 + $0x8e4] ss:$24 sps:$4 sm:$0xff]   ;;  %v3561_v57 = vld [vmem:[#allocation5 + $0x8e0] ss:$24 sps:$4 sm:$0xff]  }
 0x17f   : > { %2370 = vmatprep.subr.bf16.mxu0 %v3479_v58  ;;  %v595_v58 = vlaneseq }
 0x181   : > { %2289 = vmatpush1.bf16.msra.mxu1 %v3474_v59  ;;  %v596_v59 = vshrl.u32 %v595_v58, 7 }
 0x182   : > { %2371 = vmatpush1.bf16.msra.mxu0 %v3477_v60  ;;  %2290 = vmatprep.subr.bf16.mxu1 %v3482_v61  ;;  %v593_v61 = vld [vmem:[#allocation7] sm:$0x3f] }
 0x183   : > { %2372 = vmatprep.subr.bf16.mxu0 %v3485_v62  ;;  %v4086_v60 = vsub.s32 0, %v596_v59  ;;  %v4088_v62 = vsub.s32 1, %v596_v59 }
 0x185   : > { %2291 = vmatpush1.bf16.msra.mxu1 %v3480_v63  ;;  %v598_v63 = vrot.slane %v593_v61, %v4086_v60 }
 0x186   : > { %2373 = vmatpush1.bf16.msra.mxu0 %v3483_v0  ;;  %2292 = vmatprep.subr.bf16.mxu1 %v3488_v1  ;;  %v602_v0 = vrot.slane %v593_v61, %v4088_v62 }
 0x187   : > { %2374 = vmatprep.subr.bf16.mxu0 %v3491_v2 }
 0x189   : > { %2293 = vmatpush1.bf16.msra.mxu1 %v3486_v3 }
 0x18a   : > { %2375 = vmatpush1.bf16.msra.mxu0 %v3489_v4  ;;  %2294 = vmatprep.subr.bf16.mxu1 %v3494_v5 }
 0x18b   : > { %2376 = vmatprep.subr.bf16.mxu0 %v3497_v6 }
 0x18d   : > { %2295 = vmatpush1.bf16.msra.mxu1 %v3492_v7 }
 0x18e   : > { %2377 = vmatpush1.bf16.msra.mxu0 %v3495_v8  ;;  %2296 = vmatprep.subr.bf16.mxu1 %v3500_v9 }
 0x18f   : > { %2378 = vmatprep.subr.bf16.mxu0 %v3503_v12 }
 0x191   : > { %2297 = vmatpush1.bf16.msra.mxu1 %v3498_v13 }
 0x192   : > { %2379 = vmatpush1.bf16.msra.mxu0 %v3501_v14  ;;  %2298 = vmatprep.subr.bf16.mxu1 %v3506_v15  ;;  %v4096_v14 = vsub.s32 2, %v596_v59 }
 0x193   : > { %2380 = vmatprep.subr.bf16.mxu0 %v3509_v16  ;;  %v4099_v16 = vsub.s32 3, %v596_v59 }
 0x194   : > { %v606_v15 = vrot.slane %v593_v61, %v4096_v14 }
 0x195   : > { %2299 = vmatpush1.bf16.msra.mxu1 %v3504_v18 }
 0x196   : > { %2381 = vmatpush1.bf16.msra.mxu0 %v3507_v19  ;;  %2300 = vmatprep.subr.bf16.mxu1 %v3512_v20  ;;  %v610_v19 = vrot.slane %v593_v61, %v4099_v16 }
 0x197   : > { %2382 = vmatprep.subr.bf16.mxu0 %v3515_v21 }
 0x199   : > { %2301 = vmatpush1.bf16.msra.mxu1 %v3510_v22  ;;  %v4108_v22 = vsub.s32 4, %v596_v59 }
 0x19a   : > { %2383 = vmatpush1.bf16.msra.mxu0 %v3513_v23  ;;  %v4110_v23 = vsub.s32 5, %v596_v59 }
 0x19b   : > { %2393 = vmatprep.subr.bf16.mxu0 %v3518_v24 }
 0x19c   : > { %2303 = vmatmul.mubr.bf16.vlgmr.msra.gmra.mrb[4].mxu1 %v4072_v17 }
 0x19d   : > { %2385 = vmatmul.mubr.bf16.vlgmr.msra.gmra.mrb[4].mxu0 %v4062_v11  ;;  %v3531_v11 = vld [vmem:[#allocation5 + $0x700] ss:$24 sps:$4 sm:$0xff]  }
 0x19e   : > { %2394 = vmatpush1.bf16.msra.mxu0 %v3516_v25  ;;  %2425 = vmatprep.mubr.bf16.mxu0 %v4068_v35 }
 0x19f   : > { %2395 = vmatprep.subr.bf16.mxu0 %v3521_v26 }
 0x1a2   : > { %2396 = vmatpush1.bf16.msra.mxu0 %v3519_v27 }
 0x1a3   : > { %2397 = vmatprep.subr.bf16.mxu0 %v3524_v28 }
 0x1a6   : > { %2398 = vmatpush1.bf16.msra.mxu0 %v3522_v29  ;;  %v614_v29 = vrot.slane %v593_v61, %v4108_v22 }
 0x1a7   : > { %2399 = vmatprep.subr.bf16.mxu0 %v3527_v30  ;;  %v618_v30 = vrot.slane %v593_v61, %v4110_v23 }
 0x1aa   : > { %2400 = vmatpush1.bf16.msra.mxu0 %v3525_v31 }
 0x1ab   : > { %2401 = vmatprep.subr.bf16.mxu0 %v3530_v32 }
 0x1ae   : > { %2402 = vmatpush1.bf16.msra.mxu0 %v3528_v33 }
 0x1af   : > { %2403 = vmatprep.subr.bf16.mxu0 %v3533_v10  ;;  %v2099_v47 = vpop.f32.mrb[0].mxu1 }
 0x1b0   : > { %v2101_v35 = vpop.f32.mrb[1].mxu1  ;;  %v2100_v1 = vadd.f32 %v2099_v47, %v598_v63 }
 0x1b1   : > { %v2103_v37 = vpop.f32.mrb[2].mxu1  ;;  %v2102_v2 = vadd.f32 %v2101_v35, %v602_v0 }
 0x1b2   : > { %2404 = vmatpush1.bf16.msra.mxu0 %v3531_v11  ;;  %v2104_v51 = vpop.f32.mrb[3].mxu1 }
 0x1b3   : > { %2405 = vmatprep.subr.bf16.mxu0 %v3536_v34 }
 0x1b6   : > { %2406 = vmatpush1.bf16.msra.mxu0 %v3534_v36 }
 0x1b7   : > { %2407 = vmatprep.subr.bf16.mxu0 %v3539_v38 }
 0x1ba   : > { %2408 = vmatpush1.bf16.msra.mxu0 %v3537_v39 }
 0x1bb   : > { %2409 = vmatprep.subr.bf16.mxu0 %v3542_v40 }
 0x1be   : > { %2410 = vmatpush1.bf16.msra.mxu0 %v3540_v41 }
 0x1bf   : > { %2411 = vmatprep.subr.bf16.mxu0 %v3545_v42 }
 0x1c2   : > { %2412 = vmatpush1.bf16.msra.mxu0 %v3543_v43 }
 0x1c3   : > { %2413 = vmatprep.subr.bf16.mxu0 %v3548_v44 }
 0x1c6   : > { %2414 = vmatpush1.bf16.msra.mxu0 %v3546_v45 }
 0x1c7   : > { %2415 = vmatprep.subr.bf16.mxu0 %v3551_v46 }
 0x1ca   : > { %2416 = vmatpush1.bf16.msra.mxu0 %v3549_v48 }
 0x1cb   : > { %2417 = vmatprep.subr.bf16.mxu0 %v3554_v49 }
 0x1ce   : > { %2418 = vmatpush1.bf16.msra.mxu0 %v3552_v50 }
 0x1cf   : > { %2419 = vmatprep.subr.bf16.mxu0 %v3557_v52 }
 0x1d2   : > { %2420 = vmatpush1.bf16.msra.mxu0 %v3555_v53  ;;  %v2468_v53 = vld [vmem:[#allocation8] sm:$0x3f] }
 0x1d3   : > { %2421 = vmatprep.subr.bf16.mxu0 %v3560_v54  ;;  %v2512_v54 = vld [vmem:[#allocation10] sm:$0x3f]  ;;  %v2485_v58 = vrot.slane %v2468_v53, %v4099_v16  ;;  %v2489_v63 = vrot.slane %v2468_v53, %v4108_v22  ;;  %v2493_v0 = vrot.slane %v2468_v53, %v4110_v23 }
 0x1d4   : > { %v2517_v59 = vrot.slane %v2512_v54, %v4086_v60  ;;  %v2521_v61 = vrot.slane %v2512_v54, %v4088_v62 }
 0x1d6   : > { %2422 = vmatpush1.bf16.msra.mxu0 %v3558_v55  ;;  %v2473_v55 = vrot.slane %v2468_v53, %v4086_v60 }
 0x1d7   : > { %2423 = vmatprep.subr.bf16.mxu0 %v3563_v56  ;;  %v2477_v56 = vrot.slane %v2468_v53, %v4088_v62 }
 0x1da   : > { %2424 = vmatpush1.bf16.msra.mxu0 %v3561_v57  ;;  %v2481_v57 = vrot.slane %v2468_v53, %v4096_v14 }
 0x1dd   : > { %2426 = vmatmul.mubr.bf16.vlgmr.msra.gmra.mrb[4].mxu0 %v4072_v17 }
 0x1f0   : > { %v2181_v3 = vpop.f32.mrb[0].mxu0 }
 0x1f1   : > { %v4092_v4 = vadd.f32 %v2181_v3, %v2100_v1  ;;  %v2183_v5 = vpop.f32.mrb[1].mxu0  ;;  %v2525_v1 = vrot.slane %v2512_v54, %v4096_v14  ;;  %v2533_v3 = vrot.slane %v2512_v54, %v4108_v22 }
 0x1f2   : > { %v4094_v6 = vadd.f32 %v2183_v5, %v2102_v2  ;;  %v2185_v17 = vpop.f32.mrb[2].mxu0  ;;  %v2529_v2 = vrot.slane %v2512_v54, %v4099_v16  ;;  %v2537_v5 = vrot.slane %v2512_v54, %v4110_v23 }
 0x1f3   : > { %v2186_v7 = vpop.f32.mrb[3].mxu0  ;;  %v2443_v20 = vmul.f32 %v4092_v4, %v4092_v4 }
 0x1f4   : > { %v2444_v21 = vmul.f32 %v4094_v6, %v4094_v6  ;;  %v2434_v24 = vadd.f32 %v4094_v6, %v4092_v4 }
 0x1f6   : > { %v2449_v27 = vadd.f32 %v2444_v21, %v2443_v20 }
 0x26f   : > { %v2304_v8 = vpop.f32.mrb[4].mxu1 }
 0x270   : > { %v2306_v9 = vpop.f32.mrb[5].mxu1  ;;  %v4101_v18 = vadd.f32 %v2304_v8, %v606_v15 }
 0x271   : > { %v2308_v12 = vpop.f32.mrb[6].mxu1  ;;  %v4116_v26 = vadd.f32 %v2306_v9, %v610_v19 }
 0x272   : > { %v2309_v13 = vpop.f32.mrb[7].mxu1  ;;  %v2445_v25 = vmul.f32 %v4101_v18, %v4101_v18  ;;  %v2435_v28 = vadd.f32 %v4101_v18, %v2434_v24 }
 0x273   : > { %v2446_v32 = vmul.f32 %v4116_v26, %v4116_v26 }
 0x274   : > { %v2450_v31 = vadd.f32 %v2449_v27, %v2445_v25  ;;  %v2436_v34 = vadd.f32 %v4116_v26, %v2435_v28 }
 0x276   : > { %v2451_v51 = vadd.f32 %v2450_v31, %v2446_v32 }
 0x2b0   : > { %v2427_v33 = vpop.f32.mrb[4].mxu0 }
 0x2b1   : > { %v3016_v10 = vadd.f32 %v2427_v33, %v614_v29  ;;  %v2429_v11 = vpop.f32.mrb[5].mxu0 }
 0x2b2   : > { %v3017_v47 = vadd.f32 %v2429_v11, %v618_v30  ;;  %v2431_v35 = vpop.f32.mrb[6].mxu0 }
 0x2b3   : > { %v2447_v36 = vmul.f32 %v3016_v10, %v3016_v10  ;;  %v2432_v37 = vpop.f32.mrb[7].mxu0  ;;  %v2437_v38 = vadd.f32 %v3016_v10, %v2436_v34 }
 0x2b4   : > { %v2448_v40 = vmul.f32 %v3017_v47, %v3017_v47 }
 0x2b5   : > { %v2438_v39 = vadd.f32 %v3017_v47, %v2437_v38  ;;  %v2452_v41 = vadd.f32 %v2451_v51, %v2447_v36 }
 0x2b7   : > { %2439 = vadd.xlane.f32.xlu0 %v2438_v39  ;;  %v2453_v42 = vadd.f32 %v2452_v41, %v2448_v40 }
 0x2bb   : > { %2454 = vadd.xlane.f32.xlu0 %v2453_v42 }
 0x344   : > { %v2440_v43 = vpop.xlane.xlu0 %2439 }
 0x345   : > { %v2442_v44 = vmul.f32 0.0013020834, %v2440_v43 }
 0x347   : > { %v2457_v46 = vmul.f32 %v2442_v44, %v2442_v44  ;;  %v2462_v7 = vsub.f32 %v4092_v4, %v2442_v44  ;;  %v2463_v60 = vsub.f32 %v4094_v6, %v2442_v44  ;;  %v2464_v62 = vsub.f32 %v4101_v18, %v2442_v44 }
 0x348   : > { %v2455_v45 = vpop.xlane.xlu0 %2454  ;;  %v2465_v8 = vsub.f32 %v4116_v26, %v2442_v44  ;;  %v2466_v15 = vsub.f32 %v3016_v10, %v2442_v44  ;;  %v2467_v16 = vsub.f32 %v3017_v47, %v2442_v44 }
 0x349   : > { %v2456_v48 = vmul.f32 0.0013020834, %v2455_v45 }
 0x34b   : > { %v2458_v49 = vsub.f32 %v2456_v48, %v2457_v46 }
 0x34d   : > { %v2459_v50 = vmax.f32 %v2458_v49, 0.0 }
 0x34f   : > { %v2460_v52 = vadd.f32 1e-12, %v2459_v50 }
 0x351   : > { %3564 = vrsqrt.f32 %v2460_v52 }
 0x35b   : > { %v3565_v17 = vpop.eup %3564 }
 0x35c   : > { %v2500_v9 = vmul.f32 %v3565_v17, %v2473_v55  ;;  %v2501_v12 = vmul.f32 %v3565_v17, %v2477_v56  ;;  %v2502_v13 = vmul.f32 %v3565_v17, %v2481_v57  ;;  %v2503_v14 = vmul.f32 %v3565_v17, %v2485_v58 }
 0x35d   : > { %v2504_v19 = vmul.f32 %v3565_v17, %v2489_v63  ;;  %v2505_v20 = vmul.f32 %v3565_v17, %v2493_v0 }
 0x35e   : > { %v2506_v21 = vmul.f32 %v2500_v9, %v2462_v7  ;;  %v2507_v22 = vmul.f32 %v2501_v12, %v2463_v60  ;;  %v2508_v23 = vmul.f32 %v2502_v13, %v2464_v62  ;;  %v2509_v24 = vmul.f32 %v2503_v14, %v2465_v8 }
 0x35f   : > { %v2510_v4 = vmul.f32 %v2504_v19, %v2466_v15  ;;  %v2511_v25 = vmul.f32 %v2505_v20, %v2467_v16 }
 0x360   : > { %v2544_v6 = vadd.f32 %v2517_v59, %v2506_v21  ;;  %v2545_v18 = vadd.f32 %v2521_v61, %v2507_v22  ;;  %v2546_v27 = vadd.f32 %v2525_v1, %v2508_v23  ;;  %v2547_v26 = vadd.f32 %v2529_v2, %v2509_v24 }
 0x361   : > { %v2548_v28 = vadd.f32 %v2533_v3, %v2510_v4  ;;  %v2549_v29 = vadd.f32 %v2537_v5, %v2511_v25 }
 0x362   : > { %v3007_v30 = vpack.c.bf16 %v2545_v18, %v2544_v6  ;;  %v3008_v31 = vpack.c.bf16 %v2547_v26, %v2546_v27 }
 0x363   : > { %v3009_v32 = vpack.c.bf16 %v2549_v29, %v2548_v28 }
 0x364   : > { %2574 = vst [vmem:[%s292_s12] sm:$0xff] %v3007_v30  ;;  %2575 = vst [vmem:[%s292_s12 + $0x8] sm:$0xff] %v3008_v31 }
 0x365   : > { %2576 = vst [vmem:[%s292_s12 + $0x10] sm:$0xff] %v3009_v32 }
 0x366   : > { %3721 = shalt.err (!%p3718_p0)
}
 0x367   : > { %s3722_s16 = scalar_lea.hbm %s4145_s23, 384  ;;  %s3726_s26 = scalar_lea.hbm %s4194_s5, 768 }
 0x368   : > { %p3723_p2 = scmp.ne.s32.totalorder %s4145_s23, %s3722_s16  ;;  %p3727_p10 = scmp.lt.u32.totalorder %s4145_s23, %s4194_s5 }
 0x369   : > { %p3728_p11 = scmp.lt.u32.totalorder %s3726_s26, %s3722_s16  ;;  %p3730_p5 = scmp.lt.u32.totalorder %s3722_s16, %s4145_s23 }
 0x36a   : > { %p3724_p8 = pnand %p3723_p2, %p4211_p6 }
 0x36b   : > { %p3729_p1 = por %p3728_p11, %p3727_p10 }
 0x36c   : > { %p3725_p4 = pneg %p3724_p8 }
 0x36d   : > { %p3731_p7 = por %p3730_p5, %p3729_p1 }
 0x36f   : > { %p3732_p9 = pnand %p3731_p7, %p3725_p4 }
 0x371   : > { %3735 = shalt.err (!%p3732_p9)
}
 0x372   : > { %3061 = dma.vmem_to_hbm [thread:$0]  (%p4211_p6), %s4147_s15, 384, %s4145_s23, %s2578_s24  }
 0x373 PF: > { %s2604_s6 = sand.u32 1, %s3770_s18   ;;  %p4212_p12 = scmp.ne.s32.totalorder %s4204_s9, 0 }
 0x374   : > { %p4213_p3 = scmp.ge.s32.totalorder %s3782_s21, 2  ;;  %s2605_s12 = scalar_lea.sflag [#allocation4], %s2604_s6 }
 0x376   : > { %p3081_p13 = pnand %p4213_p3, %p4212_p12 }
 0x378   : > { %3765 = dma.done.wait (!%p3081_p13), %s2605_s12, 384  }
 0x379   : > { %3767 = vsyncadd (!%p3081_p13), %s2605_s12, 4294966912  ;;  %p20_p0 = scmp.ge.s32.totalorder %s3962_s28, 4   ;;  %s4214_s18 = smov %s3774_s19 }
 0x37a   : > { %s4215_s19 = smov %s3778_s20  ;;  %s4216_s20 = smov %s3973_s27 }
 0x37b   : > { %s4217_s21 = smov %s3962_s28  ;;  %22 = sbr.rel (!%p20_p0) target bundleno = 7 (0x7), region = 101 }
 0x382   :  { %2610 = vsyncpa [#allocation3], 1 }
 0x383   :  { %2612 = vsyncpa [#allocation3 + $0x1], 1 }
 0x384   :  { %2613 = vsyncpa [#allocation6], 1 }
 0x385   :  { %2614 = vsyncpa [#allocation9], 1 }
 0x386   :  { %2615 = vsyncpa [#allocation4], 1 }
 0x387   :  { %2617 = vsyncpa [#allocation4 + $0x1], 1 }

</bundles_post_ra>
